<compile_context>
chip_gen: v7x
topology: tpu7x:2x2x1
jax: 0.10.0
libtpu: 0.0.40
codegen_flags: <defaults>
</compile_context>

<pallas_src>
import numpy as np
import jax
import jax.numpy as jnp
from jax import lax
from jax.experimental import pallas as pl
from jax.experimental.pallas import tpu as pltpu
from jax.scipy.linalg import block_diag

# ----------------------------- module constants ----------------------------
MASK_SIZE = 11
NETWORK_SETUP = {
    "filters": 8, "kernel_size": MASK_SIZE, "stride": 2, "dilation": 1,
    "filters1": 16, "kernel_size1": 4, "pooling_size": 2,
    "state_neurons": 40, "hidden_neurons": [40, 40],
}
NUMBER_OF_MODES = 4

# network chromosome (static choices)
POOL1 = 0   # MaxPool2d(2)
POOL2 = 1   # AvgPool2d(2)  -- the pool2+lin2 fusion below REQUIRES this choice
ACT1, ACT2, ACT3, ACT4, ACT5 = 2, 6, 0, 4, 2   # tanh, relu, sigmoid, softsign, tanh

# landscape size chosen so the conv stack gives CONV_SIZE = 64
L = 51
K1, F1 = NETWORK_SETUP["kernel_size"], NETWORK_SETUP["filters"]
K2, F2 = NETWORK_SETUP["kernel_size1"], NETWORK_SETUP["filters1"]
STRIDE = NETWORK_SETUP["stride"]
OH1 = (L - K1) // STRIDE + 1          # 21
P1 = OH1 // 2                         # 10  (after pool1)
OH2 = (P1 - K2) // STRIDE + 1         # 4
P2 = OH2 // 2                         # 2   (after pool2)
CONV_SIZE = F2 * P2 * P2              # 64
SN = NETWORK_SETUP["state_neurons"]   # 40
H0, H1 = NETWORK_SETUP["hidden_neurons"]  # 40, 40
STATE_DIM = NUMBER_OF_MODES + 5       # 9

S2 = OH2 * OH2                        # 16  conv2 output positions
LANES1 = K2 * K2 * F1                 # 128 (conv2-kernel-offset, conv1-channel)
PATCH_COLS = K2 * K2 * K1 * K1        # 1936
NPOOL1 = 4                            # 2x2 pool1 offsets


# ------------------------------- activations --------------------------------
def apply_activation(kind, x):
    """Static dispatch of the chromosome activation (works in-kernel and in ref)."""
    if kind == 0:   # Sigmoid
        return 1.0 / (1.0 + jnp.exp(-x))
    if kind == 1:   # Hardsigmoid
        return jnp.clip(x / 6.0 + 0.5, 0.0, 1.0)
    if kind == 2:   # tanh
        return jnp.tanh(x)
    if kind == 3:   # Hardtanh
        return jnp.clip(x, -1.0, 1.0)
    if kind == 4:   # Softsign
        return x / (1.0 + jnp.abs(x))
    if kind == 5:   # Softplus  # TODO(synk): PyTorch's threshold=20 linearization ignored
        return jnp.log1p(jnp.exp(x))
    if kind == 6:   # relu
        return jnp.maximum(x, 0.0)
    raise ValueError(kind)


# --------------------------------- kernel ------------------------------------
def controller_kernel(patches_ref, state_ref, past_ref,
                      w1big_ref, wk128_ref, wconv2_ref, wcat_ref, colsid_ref,
                      rs_ref, cs_ref, wdense_ref, bdense_ref, out_ref):
    f32 = jnp.float32
    dot = lambda a, b: jnp.dot(a, b, preferred_element_type=f32)

    B = out_ref.shape[0]
    BR = B * S2                       # rows per pool1-offset block

    wk = wk128_ref[...]               # (42,128): rows 0:40 out-proj, 40 conv1 bias, 41 out bias
    bd = bdense_ref[...]              # (3, 40):  inp_b, lin3_b, lin4_b

    # ---- conv1: one block-diagonal matmul; lanes = (conv2-offset, conv1-channel) ----
    h1 = dot(patches_ref[...], w1big_ref[...]) + wk[40:41, :]        # (4*B*16, 128) f32
    h1 = apply_activation(ACT1, h1)

    # ---- pool1 over the 4 pooling-offset row blocks (chromosome: MaxPool) ----
    blocks = [h1[t * BR:(t + 1) * BR, :] for t in range(NPOOL1)]
    if POOL1 == 0:
        m1 = jnp.maximum(jnp.maximum(blocks[0], blocks[1]),
                         jnp.maximum(blocks[2], blocks[3]))           # (B*16, 128)
    else:
        m1 = (blocks[0] + blocks[1] + blocks[2] + blocks[3]) * 0.25

    # ---- conv2: single matmul over the 128 (offset, channel) lanes ----
    h2 = dot(m1, wconv2_ref[0:LANES1, :]) + wconv2_ref[LANES1:LANES1 + 1, :]
    h2 = apply_activation(ACT3, h2)                                   # (B*16, 16)

    # ---- fused avg-pool2 + lin2 (mask-sandwich: expand, keep diagonal s-blocks, sum) ----
    y640 = dot(h2, wcat_ref[...])                                     # (B*16, 16*40)
    row_s = lax.broadcasted_iota(jnp.int32, y640.shape, 0) & (S2 - 1)
    z = jnp.where(row_s == colsid_ref[...], y640, 0.0)
    x = dot(dot(rs_ref[...], z), cs_ref[...])                         # (B, 40)

    # ---- state path + dense tail (batch on sublanes) ----
    y = dot(state_ref[...], wdense_ref[0:40, :]) + bd[0:1, :]
    y = apply_activation(ACT2, y)                                     # (B, 40)

    x = x + dot(y, wdense_ref[40:80, :]) + bd[1:2, :]
    x = apply_activation(ACT4, x)
    x = dot(x, wdense_ref[80:120, :]) + bd[2:3, :] + dot(past_ref[...], wdense_ref[120:160, :])
    xlat = apply_activation(ACT5, x)                                  # (B, 40)

    # ---- lane-dense output slab: [:, :40]=xlat, [:,40]=mode, [:,41]=clamped angle ----
    slab = dot(xlat, wk[0:40, :]) + wk[41:42, :]                      # (B, 128)
    col = lax.broadcasted_iota(jnp.int32, slab.shape, 1)
    slab = jnp.where(col == H1 + 1, jnp.clip(slab, -1.0, 1.0), slab)
    out_ref[...] = slab


# --------------------------------- wrapper -----------------------------------
def controller_forward_pallas(params, landscape, state, past_inp):
    f32 = jnp.float32
    B = landscape.shape[0]
    assert POOL2 == 1, "pool2+lin2 fusion below is only valid for AvgPool at pool2"

    # ---- duplicated, conv2/pool1-ordered im2col patches (static index arrays) ----
    # landscape row for (pool-offset dy, conv2 out-pos si, conv2 offset ki, conv1 pixel k1i):
    #   r = 8*si + 4*ki + 2*dy + k1i   (conv1 stride 2, pool1 size 2, conv2 stride 2)
    t1_dy = np.array([0, 0, 1, 1])
    t1_dx = np.array([0, 1, 0, 1])
    s_i, s_j = np.divmod(np.arange(S2), OH2)
    k2_i, k2_j = np.divmod(np.arange(K2 * K2), K2)
    k1_i, k1_j = np.divmod(np.arange(K1 * K1), K1)
    R = (8 * s_i)[None, :, None, None] + (4 * k2_i)[None, None, :, None] \
        + (2 * t1_dy)[:, None, None, None] + k1_i[None, None, None, :]
    C = (8 * s_j)[None, :, None, None] + (4 * k2_j)[None, None, :, None] \
        + (2 * t1_dx)[:, None, None, None] + k1_j[None, None, None, :]
    # TODO(synk): this wrapper-side gather duplicates overlapping windows (~2.3x);
    # acceptable here, could be moved in-kernel with manual DMA for huge batches.
    land = landscape.astype(jnp.bfloat16)
    pat = land[:, R, C]                                               # (B, 4, 16, 16, 121)
    patches_big = jnp.transpose(pat, (1, 0, 2, 3, 4)).reshape(
        NPOOL1 * B * S2, PATCH_COLS)                                  # (4*B*16, 1936) bf16

    # ---- parameter repacking (glue) ----
    w1flat = params["conv1_w"].reshape(F1, K1 * K1).T.astype(f32)     # (121, 8)
    w1big = block_diag(*([w1flat] * (K2 * K2))).astype(jnp.bfloat16)  # (1936, 128)

    b1big = jnp.tile(params["conv1_b"].astype(f32), K2 * K2).reshape(1, LANES1)
    wbig = jnp.zeros((H1, 128), f32)
    wbig = wbig.at[:, 0:H1].set(jnp.eye(H1, dtype=f32))
    wbig = wbig.at[:, H1:H1 + 2].set(params["output_w"].T.astype(f32))
    bbig = jnp.zeros((1, 128), f32).at[0, H1:H1 + 2].set(params["output_b"].astype(f32))
    wk128 = jnp.concatenate([wbig, b1big, bbig], axis=0)              # (42, 128)

    w2flat = jnp.transpose(params["conv2_w"], (2, 3, 1, 0)).reshape(LANES1, F2)
    wconv2 = jnp.concatenate([w2flat, params["conv2_b"].reshape(1, F2)],
                             axis=0).astype(f32)                      # (129, 16)

    # fused 0.25*lin2 over (conv2 spatial s, channel oc), expanded to (oc, s*40+h)
    p2 = (s_i // 2) * 2 + (s_j // 2)                                  # pooled-2 index per s
    col_idx = np.arange(F2)[:, None] * (P2 * P2) + p2[None, :]        # (16, 16)
    wcat = (0.25 * params["lin2_w"].T[col_idx, :]).reshape(F2, S2 * H0).astype(f32)

    colsid = jnp.asarray(np.repeat(np.arange(S2), H0).reshape(1, S2 * H0), jnp.int32)
    rs = jnp.asarray(np.kron(np.eye(B), np.ones((1, S2))), f32)       # (B, B*16)
    cs = jnp.asarray(np.tile(np.eye(H0), (S2, 1)), f32)               # (640, 40)

    winp_pad = jnp.zeros((H0, SN), f32).at[0:STATE_DIM, :].set(params["inp_w"].T.astype(f32))
    wdense = jnp.concatenate([winp_pad,
                              params["lin3_w"].T.astype(f32),
                              params["lin4_w"].T.astype(f32),
                              params["recurr_w"].T.astype(f32)], axis=0)   # (160, 40)
    bdense = jnp.stack([params["inp_b"], params["lin3_b"], params["lin4_b"]],
                       axis=0).astype(f32)                            # (3, 40)

    state_pad = jnp.zeros((B, H0), f32).at[:, 0:STATE_DIM].set(state.astype(f32))
    past = past_inp.astype(f32)

    vmem = pl.BlockSpec(memory_space=pltpu.MemorySpace.VMEM)
    out = pl.pallas_call(
        controller_kernel,
        out_shape=jax.ShapeDtypeStruct((B, 128), f32),
        in_specs=[vmem] * 12,
        out_specs=vmem,
    )(patches_big, state_pad, past, w1big, wk128, wconv2, wcat,
      colsid, rs, cs, wdense, bdense)

    xlat = out[:, 0:H1]
    mode_command = out[:, H1]
    angle_command = out[:, H1 + 1]
    return mode_command, angle_command, xlat


# ------------------------ pure-JAX reference (NCHW) --------------------------
def _ref_pool(kind, x):
    if kind == 0:
        return lax.reduce_window(x, -jnp.inf, lax.max, (1, 1, 2, 2), (1, 1, 2, 2), "VALID")
    return lax.reduce_window(x, 0.0, lax.add, (1, 1, 2, 2), (1, 1, 2, 2), "VALID") * 0.25


def controller_forward_reference(p, landscape, state, past_inp):
    dn = ("NCHW", "OIHW", "NCHW")
    x = landscape[:, None, :, :]
    x = lax.conv_general_dilated(x, p["conv1_w"], (STRIDE, STRIDE), "VALID",
                                 dimension_numbers=dn) + p["conv1_b"][None, :, None, None]
    y = state @ p["inp_w"].T + p["inp_b"]
    x = apply_activation(ACT1, x)
    y = apply_activation(ACT2, y)
    x = _ref_pool(POOL1, x)
    x = lax.conv_general_dilated(x, p["conv2_w"], (STRIDE, STRIDE), "VALID",
                                 dimension_numbers=dn) + p["conv2_b"][None, :, None, None]
    x = apply_activation(ACT3, x)
    x = _ref_pool(POOL2, x).reshape(x.shape[0], -1)              # (B, 64), channel-major
    x = x @ p["lin2_w"].T + (y @ p["lin3_w"].T + p["lin3_b"])
    x = apply_activation(ACT4, x)
    x = x @ p["lin4_w"].T + p["lin4_b"] + past_inp @ p["recurr_w"].T
    xlat = apply_activation(ACT5, x)
    out = xlat @ p["output_w"].T + p["output_b"]
    return out[:, 0], jnp.clip(out[:, -1], -1.0, 1.0), xlat


# ----------------------------------- main ------------------------------------
if __name__ == "__main__":
    key = jax.random.PRNGKey(0)
    ks = jax.random.split(key, 20)

    def rnd(k, shape, scale=0.1):
        return scale * jax.random.normal(k, shape, jnp.float32)

    params = {
        "conv1_w": rnd(ks[0], (F1, 1, K1, K1)),
        "conv1_b": rnd(ks[1], (F1,)),
        "conv2_w": rnd(ks[2], (F2, F1, K2, K2)),
        "conv2_b": rnd(ks[3], (F2,)),
        "inp_w": rnd(ks[4], (SN, STATE_DIM)),
        "inp_b": rnd(ks[5], (SN,)),
        "lin2_w": rnd(ks[6], (H0, CONV_SIZE)),
        "lin3_w": rnd(ks[7], (H0, SN)),
        "lin3_b": rnd(ks[8], (H0,)),
        "lin4_w": rnd(ks[9], (H1, H0)),
        "lin4_b": rnd(ks[10], (H1,)),
        "recurr_w": rnd(ks[11], (H1, H1)),
        "output_w": rnd(ks[12], (2, H1)),
        "output_b": rnd(ks[13], (2,)),
    }

    B = 2
    landscape = jax.random.normal(ks[14], (B, L, L), jnp.float32)
    state = jax.random.normal(ks[15], (B, STATE_DIM), jnp.float32)
    past_inp = jax.random.normal(ks[16], (B, H1), jnp.float32)

    mode, angle, xlat = controller_forward_pallas(params, landscape, state, past_inp)
    jax.block_until_ready((mode, angle, xlat))

    with jax.default_matmul_precision("highest"):
        mode_r, angle_r, xlat_r = controller_forward_reference(params, landscape, state, past_inp)
    jax.block_until_ready((mode_r, angle_r, xlat_r))

    # bf16 conv1 operands => slightly looser tolerance than pure-f32
    np.testing.assert_allclose(np.asarray(mode), np.asarray(mode_r), rtol=2e-2, atol=2e-2)
    np.testing.assert_allclose(np.asarray(angle), np.asarray(angle_r), rtol=2e-2, atol=2e-2)
    np.testing.assert_allclose(np.asarray(xlat), np.asarray(xlat_r), rtol=2e-2, atol=2e-2)

    print("KERNEL_OK")
</pallas_src>

<mosaic_0001>
module attributes {stable_mosaic.version = 11 : i64} {
  func.func @controller_kernel(%arg0: memref<128x1936xbf16, #tpu.memory_space<vmem>>, %arg1: memref<2x40xf32, #tpu.memory_space<vmem>>, %arg2: memref<2x40xf32, #tpu.memory_space<vmem>>, %arg3: memref<1936x128xbf16, #tpu.memory_space<vmem>>, %arg4: memref<42x128xf32, #tpu.memory_space<vmem>>, %arg5: memref<129x16xf32, #tpu.memory_space<vmem>>, %arg6: memref<16x640xf32, #tpu.memory_space<vmem>>, %arg7: memref<1x640xi32, #tpu.memory_space<vmem>>, %arg8: memref<2x32xf32, #tpu.memory_space<vmem>>, %arg9: memref<640x40xf32, #tpu.memory_space<vmem>>, %arg10: memref<160x40xf32, #tpu.memory_space<vmem>>, %arg11: memref<3x40xf32, #tpu.memory_space<vmem>>, %arg12: memref<2x128xf32, #tpu.memory_space<vmem>>) attributes {dimension_semantics = [], scalar_prefetch = 0 : i64, scratch_operands = 0 : i64, tpu.core_type = #tpu.core_type<tc>} {
    %c0 = arith.constant 0 : index
    %c0_0 = arith.constant 0 : index
    %0 = vector.load %arg4[%c0, %c0_0] : memref<42x128xf32, #tpu.memory_space<vmem>>, vector<42x128xf32>
    %c0_1 = arith.constant 0 : index
    %c0_2 = arith.constant 0 : index
    %1 = vector.load %arg11[%c0_1, %c0_2] : memref<3x40xf32, #tpu.memory_space<vmem>>, vector<3x40xf32>
    %c0_3 = arith.constant 0 : index
    %c0_4 = arith.constant 0 : index
    %2 = vector.load %arg0[%c0_3, %c0_4] : memref<128x1936xbf16, #tpu.memory_space<vmem>>, vector<128x1936xbf16>
    %c0_5 = arith.constant 0 : index
    %c0_6 = arith.constant 0 : index
    %3 = vector.load %arg3[%c0_5, %c0_6] : memref<1936x128xbf16, #tpu.memory_space<vmem>>, vector<1936x128xbf16>
    %cst = arith.constant dense<0.000000e+00> : vector<128x128xf32>
    %4 = tpu.matmul %2, %3, %cst {dimension_numbers = #tpu.dot_dimension_numbers<[1], [0], [0], [1], [0, 0, 1, 1], [], []>} : vector<128x1936xbf16>, vector<1936x128xbf16>, vector<128x128xf32> -> vector<128x128xf32>
    %5 = vector.extract_strided_slice %0 {offsets = [40, 0], sizes = [1, 128], strides = [1, 1]} : vector<42x128xf32> to vector<1x128xf32>
    %6 = vector.broadcast %5 : vector<1x128xf32> to vector<128x128xf32>
    %7 = arith.addf %4, %6 : vector<128x128xf32>
    %8 = math.tanh %7 : vector<128x128xf32>
    %9 = vector.extract_strided_slice %8 {offsets = [0, 0], sizes = [32, 128], strides = [1, 1]} : vector<128x128xf32> to vector<32x128xf32>
    %10 = vector.extract_strided_slice %8 {offsets = [32, 0], sizes = [32, 128], strides = [1, 1]} : vector<128x128xf32> to vector<32x128xf32>
    %11 = vector.extract_strided_slice %8 {offsets = [64, 0], sizes = [32, 128], strides = [1, 1]} : vector<128x128xf32> to vector<32x128xf32>
    %12 = vector.extract_strided_slice %8 {offsets = [96, 0], sizes = [32, 128], strides = [1, 1]} : vector<128x128xf32> to vector<32x128xf32>
    %13 = arith.maximumf %9, %10 : vector<32x128xf32>
    %14 = arith.maximumf %11, %12 : vector<32x128xf32>
    %15 = arith.maximumf %13, %14 : vector<32x128xf32>
    %c0_7 = arith.constant 0 : index
    %c0_8 = arith.constant 0 : index
    %16 = vector.load %arg5[%c0_7, %c0_8] : memref<129x16xf32, #tpu.memory_space<vmem>>, vector<128x16xf32>
    %cst_9 = arith.constant dense<0.000000e+00> : vector<32x16xf32>
    %17 = tpu.matmul %15, %16, %cst_9 {dimension_numbers = #tpu.dot_dimension_numbers<[1], [0], [0], [1], [0, 0, 1, 1], [], []>} : vector<32x128xf32>, vector<128x16xf32>, vector<32x16xf32> -> vector<32x16xf32>
    %c128 = arith.constant 128 : index
    %c0_10 = arith.constant 0 : index
    %18 = vector.load %arg5[%c128, %c0_10] : memref<129x16xf32, #tpu.memory_space<vmem>>, vector<1x16xf32>
    %19 = vector.broadcast %18 : vector<1x16xf32> to vector<32x16xf32>
    %20 = arith.addf %17, %19 : vector<32x16xf32>
    %cst_11 = arith.constant 0.000000e+00 : f32
    %21 = vector.broadcast %cst_11 : f32 to vector<32x16xf32>
    %22 = arith.subf %21, %20 : vector<32x16xf32>
    %23 = math.exp %22 : vector<32x16xf32>
    %cst_12 = arith.constant 1.000000e+00 : f32
    %24 = vector.broadcast %cst_12 : f32 to vector<32x16xf32>
    %25 = arith.addf %24, %23 : vector<32x16xf32>
    %cst_13 = arith.constant 1.000000e+00 : f32
    %26 = vector.broadcast %cst_13 : f32 to vector<32x16xf32>
    %27 = arith.divf %26, %25 : vector<32x16xf32>
    %c0_14 = arith.constant 0 : index
    %c0_15 = arith.constant 0 : index
    %28 = vector.load %arg6[%c0_14, %c0_15] : memref<16x640xf32, #tpu.memory_space<vmem>>, vector<16x640xf32>
    %cst_16 = arith.constant dense<0.000000e+00> : vector<32x640xf32>
    %29 = tpu.matmul %27, %28, %cst_16 {dimension_numbers = #tpu.dot_dimension_numbers<[1], [0], [0], [1], [0, 0, 1, 1], [], []>} : vector<32x16xf32>, vector<16x640xf32>, vector<32x640xf32> -> vector<32x640xf32>
    %30 = tpu.iota {dimensions = array<i32: 0>} : vector<32x640xi32>
    %c15_i32 = arith.constant 15 : i32
    %31 = vector.broadcast %c15_i32 : i32 to vector<32x640xi32>
    %32 = arith.andi %30, %31 : vector<32x640xi32>
    %c0_17 = arith.constant 0 : index
    %c0_18 = arith.constant 0 : index
    %33 = vector.load %arg7[%c0_17, %c0_18] : memref<1x640xi32, #tpu.memory_space<vmem>>, vector<1x640xi32>
    %34 = vector.broadcast %33 : vector<1x640xi32> to vector<32x640xi32>
    %35 = arith.cmpi eq, %32, %34 : vector<32x640xi32>
    %cst_19 = arith.constant 0.000000e+00 : f32
    %36 = vector.broadcast %cst_19 : f32 to vector<32x640xf32>
    %37 = arith.select %35, %29, %36 : vector<32x640xi1>, vector<32x640xf32>
    %c0_20 = arith.constant 0 : index
    %c0_21 = arith.constant 0 : index
    %38 = vector.load %arg8[%c0_20, %c0_21] : memref<2x32xf32, #tpu.memory_space<vmem>>, vector<2x32xf32>
    %cst_22 = arith.constant dense<0.000000e+00> : vector<2x640xf32>
    %39 = tpu.matmul %38, %37, %cst_22 {dimension_numbers = #tpu.dot_dimension_numbers<[1], [0], [0], [1], [0, 0, 1, 1], [], []>} : vector<2x32xf32>, vector<32x640xf32>, vector<2x640xf32> -> vector<2x640xf32>
    %c0_23 = arith.constant 0 : index
    %c0_24 = arith.constant 0 : index
    %40 = vector.load %arg9[%c0_23, %c0_24] : memref<640x40xf32, #tpu.memory_space<vmem>>, vector<640x40xf32>
    %cst_25 = arith.constant dense<0.000000e+00> : vector<2x40xf32>
    %41 = tpu.matmul %39, %40, %cst_25 {dimension_numbers = #tpu.dot_dimension_numbers<[1], [0], [0], [1], [0, 0, 1, 1], [], []>} : vector<2x640xf32>, vector<640x40xf32>, vector<2x40xf32> -> vector<2x40xf32>
    %c0_26 = arith.constant 0 : index
    %c0_27 = arith.constant 0 : index
    %42 = vector.load %arg1[%c0_26, %c0_27] : memref<2x40xf32, #tpu.memory_space<vmem>>, vector<2x40xf32>
    %c0_28 = arith.constant 0 : index
    %c0_29 = arith.constant 0 : index
    %43 = vector.load %arg10[%c0_28, %c0_29] : memref<160x40xf32, #tpu.memory_space<vmem>>, vector<40x40xf32>
    %cst_30 = arith.constant dense<0.000000e+00> : vector<2x40xf32>
    %44 = tpu.matmul %42, %43, %cst_30 {dimension_numbers = #tpu.dot_dimension_numbers<[1], [0], [0], [1], [0, 0, 1, 1], [], []>} : vector<2x40xf32>, vector<40x40xf32>, vector<2x40xf32> -> vector<2x40xf32>
    %45 = vector.extract_strided_slice %1 {offsets = [0, 0], sizes = [1, 40], strides = [1, 1]} : vector<3x40xf32> to vector<1x40xf32>
    %46 = vector.broadcast %45 : vector<1x40xf32> to vector<2x40xf32>
    %47 = arith.addf %44, %46 : vector<2x40xf32>
    %cst_31 = arith.constant 0.000000e+00 : f32
    %48 = vector.broadcast %cst_31 : f32 to vector<2x40xf32>
    %49 = arith.maximumf %47, %48 : vector<2x40xf32>
    %c40 = arith.constant 40 : index
    %c0_32 = arith.constant 0 : index
    %50 = vector.load %arg10[%c40, %c0_32] : memref<160x40xf32, #tpu.memory_space<vmem>>, vector<40x40xf32>
    %cst_33 = arith.constant dense<0.000000e+00> : vector<2x40xf32>
    %51 = tpu.matmul %49, %50, %cst_33 {dimension_numbers = #tpu.dot_dimension_numbers<[1], [0], [0], [1], [0, 0, 1, 1], [], []>} : vector<2x40xf32>, vector<40x40xf32>, vector<2x40xf32> -> vector<2x40xf32>
    %52 = arith.addf %41, %51 : vector<2x40xf32>
    %53 = vector.extract_strided_slice %1 {offsets = [1, 0], sizes = [1, 40], strides = [1, 1]} : vector<3x40xf32> to vector<1x40xf32>
    %54 = vector.broadcast %53 : vector<1x40xf32> to vector<2x40xf32>
    %55 = arith.addf %52, %54 : vector<2x40xf32>
    %56 = math.absf %55 : vector<2x40xf32>
    %cst_34 = arith.constant 1.000000e+00 : f32
    %57 = vector.broadcast %cst_34 : f32 to vector<2x40xf32>
    %58 = arith.addf %57, %56 : vector<2x40xf32>
    %59 = arith.divf %55, %58 : vector<2x40xf32>
    %c80 = arith.constant 80 : index
    %c0_35 = arith.constant 0 : index
    %60 = vector.load %arg10[%c80, %c0_35] : memref<160x40xf32, #tpu.memory_space<vmem>>, vector<40x40xf32>
    %cst_36 = arith.constant dense<0.000000e+00> : vector<2x40xf32>
    %61 = tpu.matmul %59, %60, %cst_36 {dimension_numbers = #tpu.dot_dimension_numbers<[1], [0], [0], [1], [0, 0, 1, 1], [], []>} : vector<2x40xf32>, vector<40x40xf32>, vector<2x40xf32> -> vector<2x40xf32>
    %62 = vector.extract_strided_slice %1 {offsets = [2, 0], sizes = [1, 40], strides = [1, 1]} : vector<3x40xf32> to vector<1x40xf32>
    %63 = vector.broadcast %62 : vector<1x40xf32> to vector<2x40xf32>
    %64 = arith.addf %61, %63 : vector<2x40xf32>
    %c0_37 = arith.constant 0 : index
    %c0_38 = arith.constant 0 : index
    %65 = vector.load %arg2[%c0_37, %c0_38] : memref<2x40xf32, #tpu.memory_space<vmem>>, vector<2x40xf32>
    %c120 = arith.constant 120 : index
    %c0_39 = arith.constant 0 : index
    %66 = vector.load %arg10[%c120, %c0_39] : memref<160x40xf32, #tpu.memory_space<vmem>>, vector<40x40xf32>
    %cst_40 = arith.constant dense<0.000000e+00> : vector<2x40xf32>
    %67 = tpu.matmul %65, %66, %cst_40 {dimension_numbers = #tpu.dot_dimension_numbers<[1], [0], [0], [1], [0, 0, 1, 1], [], []>} : vector<2x40xf32>, vector<40x40xf32>, vector<2x40xf32> -> vector<2x40xf32>
    %68 = arith.addf %64, %67 : vector<2x40xf32>
    %69 = math.tanh %68 : vector<2x40xf32>
    %70 = vector.extract_strided_slice %0 {offsets = [0, 0], sizes = [40, 128], strides = [1, 1]} : vector<42x128xf32> to vector<40x128xf32>
    %cst_41 = arith.constant dense<0.000000e+00> : vector<2x128xf32>
    %71 = tpu.matmul %69, %70, %cst_41 {dimension_numbers = #tpu.dot_dimension_numbers<[1], [0], [0], [1], [0, 0, 1, 1], [], []>} : vector<2x40xf32>, vector<40x128xf32>, vector<2x128xf32> -> vector<2x128xf32>
    %72 = vector.extract_strided_slice %0 {offsets = [41, 0], sizes = [1, 128], strides = [1, 1]} : vector<42x128xf32> to vector<1x128xf32>
    %73 = vector.broadcast %72 : vector<1x128xf32> to vector<2x128xf32>
    %74 = arith.addf %71, %73 : vector<2x128xf32>
    %75 = tpu.iota {dimensions = array<i32: 1>} : vector<2x128xi32>
    %c41_i32 = arith.constant 41 : i32
    %76 = vector.broadcast %c41_i32 : i32 to vector<2x128xi32>
    %77 = arith.cmpi eq, %75, %76 : vector<2x128xi32>
    %cst_42 = arith.constant -1.000000e+00 : f32
    %cst_43 = arith.constant 1.000000e+00 : f32
    %78 = vector.broadcast %cst_42 : f32 to vector<2x128xf32>
    %79 = arith.maximumf %78, %74 : vector<2x128xf32>
    %80 = vector.broadcast %cst_43 : f32 to vector<2x128xf32>
    %81 = arith.minimumf %80, %79 : vector<2x128xf32>
    %82 = arith.select %77, %81, %74 : vector<2x128xi1>, vector<2x128xf32>
    %c0_44 = arith.constant 0 : index
    %c0_45 = arith.constant 0 : index
    %83 = vector.load %arg12[%c0_44, %c0_45] : memref<2x128xf32, #tpu.memory_space<vmem>>, vector<2x128xf32>
    tpu.vector_store %arg12[%c0_44, %c0_45], %82 {strides = array<i32>} : memref<2x128xf32, #tpu.memory_space<vmem>>, vector<2x128xf32>,
    return
  }
}

</mosaic_0001>

<bundles_post_ra>
// kernel: tpu_custom_call.1
= control target key start
LH: loop header
LB: loop body
LE: loop exit
PB: predicated region body
PF: predicated region fallthrough
CT: control target
= control target key end

     0   :  { %s7113_s0 = inlined_call_operand.vmem [shape: bf16[128,1936], index: 0, kind: input, shape index: {}]   ;;  %s7114_s1 = inlined_call_operand.vmem [shape: f32[2,40], index: 1, kind: input, shape index: {}]   ;;  %s7115_s2 = inlined_call_operand.vmem [shape: f32[2,40], index: 2, kind: input, shape index: {}]   ;;  %s7116_s3 = inlined_call_operand.vmem [shape: bf16[1936,128], index: 3, kind: input, shape index: {}]   ;;  %s7117_s4 = inlined_call_operand.vmem [shape: f32[42,128], index: 4, kind: input, shape index: {}]   ;;  %s7118_s5 = inlined_call_operand.vmem [shape: f32[129,16], index: 5, kind: input, shape index: {}]   ;;  %s7119_s6 = inlined_call_operand.vmem [shape: f32[16,640], index: 6, kind: input, shape index: {}]   ;;  %s7120_s7 = inlined_call_operand.vmem [shape: s32[1,640], index: 7, kind: input, shape index: {}]   ;;  %s7121_s8 = inlined_call_operand.vmem [shape: f32[2,32], index: 8, kind: input, shape index: {}]   ;;  %s7122_s9 = inlined_call_operand.vmem [shape: f32[640,40], index: 9, kind: input, shape index: {}]   ;;  %s7123_s10 = inlined_call_operand.vmem [shape: f32[160,40], index: 10, kind: input, shape index: {}]   ;;  %s7124_s11 = inlined_call_operand.vmem [shape: f32[3,40], index: 11, kind: input, shape index: {}]   ;;  %s7125_s12 = inlined_call_operand.hbm [shape: f32[2,128], index: 12, kind: output, shape index: {}]  }
   0x1   :  { %v5308_v0 = vld [vmem:[%s7116_s3 + $0x40] sm:$0xff]   ;;  %v5312_v4 = vld [vmem:[%s7116_s3 + $0x48] sm:$0xff]   ;;  %v5316_v8 = vld [vmem:[%s7116_s3 + $0x50] sm:$0xff]  }
   0x2   :  { %v5309_v1 = vld [vmem:[%s7116_s3] sm:$0xff]   ;;  %4335 = vmatprep.subr.bf16.mxu0 %v5308_v0  ;;  %v5313_v5 = vld [vmem:[%s7116_s3 + $0x8] sm:$0xff]   ;;  %v5317_v9 = vld [vmem:[%s7116_s3 + $0x10] sm:$0xff]  }
   0x3   :  { %v5310_v2 = vld [vmem:[%s7116_s3 + $0xc0] sm:$0xff]   ;;  %4336 = vmatpush3.bf16.msra.mxu0 %v5309_v1  ;;  %v5314_v6 = vld [vmem:[%s7116_s3 + $0xc8] sm:$0xff]   ;;  %v5318_v10 = vld [vmem:[%s7116_s3 + $0xd0] sm:$0xff]  }
   0x4   :  { %v5311_v3 = vld [vmem:[%s7116_s3 + $0x80] sm:$0xff]   ;;  %4399 = vmatprep.subr.bf16.mxu1 %v5310_v2  ;;  %4337 = vmatprep.subr.bf16.mxu0 %v5312_v4  ;;  %v5315_v7 = vld [vmem:[%s7116_s3 + $0x88] sm:$0xff]   ;;  %v5319_v11 = vld [vmem:[%s7116_s3 + $0x90] sm:$0xff]  }
   0x5   :  { %4400 = vmatpush3.bf16.msra.mxu1 %v5311_v3  ;;  %v5320_v12 = vld [vmem:[%s7116_s3 + $0x58] sm:$0xff]   ;;  %v5324_v16 = vld [vmem:[%s7116_s3 + $0x60] sm:$0xff]   ;;  %v5328_v20 = vld [vmem:[%s7116_s3 + $0x68] sm:$0xff]  }
   0x6   :  { %4401 = vmatprep.subr.bf16.mxu1 %v5314_v6  ;;  %v5321_v13 = vld [vmem:[%s7116_s3 + $0x18] sm:$0xff]   ;;  %v5325_v17 = vld [vmem:[%s7116_s3 + $0x20] sm:$0xff]   ;;  %v5329_v21 = vld [vmem:[%s7116_s3 + $0x28] sm:$0xff]  }
   0x7   :  { %4338 = vmatpush3.bf16.msra.mxu0 %v5313_v5  ;;  %v5322_v14 = vld [vmem:[%s7116_s3 + $0xd8] sm:$0xff]   ;;  %v5326_v18 = vld [vmem:[%s7116_s3 + $0xe0] sm:$0xff]   ;;  %v5330_v22 = vld [vmem:[%s7116_s3 + $0xe8] sm:$0xff]  }
   0x8   :  { %4339 = vmatprep.subr.bf16.mxu0 %v5316_v8  ;;  %v5323_v15 = vld [vmem:[%s7116_s3 + $0x98] sm:$0xff]   ;;  %v5327_v19 = vld [vmem:[%s7116_s3 + $0xa0] sm:$0xff]   ;;  %v5331_v23 = vld [vmem:[%s7116_s3 + $0xa8] sm:$0xff]  }
   0x9   :  { %4402 = vmatpush3.bf16.msra.mxu1 %v5315_v7  ;;  %v5332_v24 = vld [vmem:[%s7116_s3 + $0x70] sm:$0xff]   ;;  %v5336_v28 = vld [vmem:[%s7116_s3 + $0x78] sm:$0xff]   ;;  %v50_v31 = vld [vmem:[%s7113_s0] sm:$0xff] }
   0xa   :  { %4403 = vmatprep.subr.bf16.mxu1 %v5318_v10  ;;  %v5333_v25 = vld [vmem:[%s7116_s3 + $0x30] sm:$0xff]   ;;  %v5337_v29 = vld [vmem:[%s7116_s3 + $0x38] sm:$0xff]   ;;  %v58_v32 = vld [vmem:[%s7113_s0 + $0x40] sm:$0xff] }
   0xb   :  { %4340 = vmatpush3.bf16.msra.mxu0 %v5317_v9  ;;  %v5334_v26 = vld [vmem:[%s7116_s3 + $0xf0] sm:$0xff]   ;;  %v5338_v30 = vld [vmem:[%s7116_s3 + $0xf8] sm:$0xff]   ;;  %v4036_v33 = vcombine.low %v50_v31, %v58_v32  ;;  %v4037_v34 = vcombine.high %v50_v31, %v58_v32  ;;  %v5340_v36 = vld [vmem:[%s7116_s3 + $0x140] sm:$0xff]  }
   0xc   :  { %4341 = vmatprep.subr.bf16.mxu0 %v5320_v12  ;;  %v5335_v27 = vld [vmem:[%s7116_s3 + $0xb0] sm:$0xff]   ;;  %v5339_v35 = vld [vmem:[%s7116_s3 + $0xb8] sm:$0xff]   ;;  %v51_v37 = vld [vmem:[%s7113_s0 + $0x8] sm:$0xff] }
   0xd   :  { %4404 = vmatpush3.bf16.msra.mxu1 %v5319_v11  ;;  %1839 = vmatprep.mubr.bf16.mxu0 %v4037_v34  ;;  %v59_v38 = vld [vmem:[%s7113_s0 + $0x48] sm:$0xff]  ;;  %v5341_v41 = vld [vmem:[%s7116_s3 + $0x100] sm:$0xff]   ;;  %v5348_v59 = vld [vmem:[%s7116_s3 + $0x150] sm:$0xff]  }
   0xe   :  { %4405 = vmatprep.subr.bf16.mxu1 %v5322_v14  ;;  %v4038_v39 = vcombine.low %v51_v37, %v59_v38  ;;  %v4039_v40 = vcombine.high %v51_v37, %v59_v38  ;;  %v5342_v42 = vld [vmem:[%s7116_s3 + $0x1c0] sm:$0xff]   ;;  %v5344_v47 = vld [vmem:[%s7116_s3 + $0x148] sm:$0xff]   ;;  %v5349_v63 = vld [vmem:[%s7116_s3 + $0x110] sm:$0xff]  }
   0xf   :  { %4342 = vmatpush3.bf16.msra.mxu0 %v5321_v13  ;;  %v5343_v43 = vld [vmem:[%s7116_s3 + $0x180] sm:$0xff]   ;;  %v67_v49 = vld [vmem:[%s7113_s0 + $0x88] sm:$0xff]  ;;  %v5350_v0 = vld [vmem:[%s7116_s3 + $0x1d0] sm:$0xff]  }
  0x10   :  { %4343 = vmatprep.subr.bf16.mxu0 %v5324_v16  ;;  %1936 = vmatprep.mubr.bf16.mxu1 %v4039_v40  ;;  %v66_v44 = vld [vmem:[%s7113_s0 + $0x80] sm:$0xff]  ;;  %v75_v50 = vld [vmem:[%s7113_s0 + $0xc8] sm:$0xff]  ;;  %v5351_v2 = vld [vmem:[%s7116_s3 + $0x190] sm:$0xff]  }
  0x11   :  { %4406 = vmatpush3.bf16.msra.mxu1 %v5323_v15  ;;  %v74_v45 = vld [vmem:[%s7113_s0 + $0xc0] sm:$0xff]  ;;  %v4055_v51 = vcombine.high %v67_v49, %v75_v50  ;;  %v5345_v52 = vld [vmem:[%s7116_s3 + $0x108] sm:$0xff]   ;;  %v4054_v54 = vcombine.low %v67_v49, %v75_v50  ;;  %v5352_v6 = vld [vmem:[%s7116_s3 + $0x158] sm:$0xff]  }
  0x12   :  { %4407 = vmatprep.subr.bf16.mxu1 %v5326_v18  ;;  %v4053_v46 = vcombine.high %v66_v44, %v74_v45  ;;  %v4052_v48 = vcombine.low %v66_v44, %v74_v45  ;;  %v5346_v53 = vld [vmem:[%s7116_s3 + $0x1c8] sm:$0xff]   ;;  %v82_v56 = vld [vmem:[%s7113_s0 + $0x100] sm:$0xff]  ;;  %v5353_v11 = vld [vmem:[%s7116_s3 + $0x118] sm:$0xff]  }
  0x13   :  { %4344 = vmatpush3.bf16.msra.mxu0 %v5325_v17  ;;  %v5347_v55 = vld [vmem:[%s7116_s3 + $0x188] sm:$0xff]   ;;  %v90_v57 = vld [vmem:[%s7113_s0 + $0x140] sm:$0xff]  ;;  %v5354_v12 = vld [vmem:[%s7116_s3 + $0x1d8] sm:$0xff]  }
  0x14   :  { %4345 = vmatprep.subr.bf16.mxu0 %v5328_v20  ;;  %v4069_v58 = vcombine.high %v82_v56, %v90_v57  ;;  %v83_v60 = vld [vmem:[%s7113_s0 + $0x108] sm:$0xff]  ;;  %v4068_v1 = vcombine.low %v82_v56, %v90_v57  ;;  %v98_v3 = vld [vmem:[%s7113_s0 + $0x180] sm:$0xff]  ;;  %v5355_v13 = vld [vmem:[%s7116_s3 + $0x198] sm:$0xff]  }
  0x15   :  { %4408 = vmatpush3.bf16.msra.mxu1 %v5327_v19  ;;  %v91_v61 = vld [vmem:[%s7113_s0 + $0x148] sm:$0xff]  ;;  %v106_v4 = vld [vmem:[%s7113_s0 + $0x1c0] sm:$0xff]  ;;  %v5366_v40 = vld [vmem:[%s7116_s3 + $0x1f0] sm:$0xff]  }
  0x16   :  { %4409 = vmatprep.subr.bf16.mxu1 %v5330_v22  ;;  %v4071_v62 = vcombine.high %v83_v60, %v91_v61  ;;  %v4085_v5 = vcombine.high %v98_v3, %v106_v4  ;;  %v99_v7 = vld [vmem:[%s7113_s0 + $0x188] sm:$0xff]  ;;  %v4070_v8 = vcombine.low %v83_v60, %v91_v61  ;;  %v114_v14 = vld [vmem:[%s7113_s0 + $0x200] sm:$0xff]  ;;  %v4084_v17 = vcombine.low %v98_v3, %v106_v4  ;;  %v5368_v44 = vld [vmem:[%s7116_s3 + $0x178] sm:$0xff]  }
  0x17   :  { %4346 = vmatpush3.bf16.msra.mxu0 %v5329_v21  ;;  %v107_v9 = vld [vmem:[%s7113_s0 + $0x1c8] sm:$0xff]  ;;  %v122_v15 = vld [vmem:[%s7113_s0 + $0x240] sm:$0xff]  ;;  %v5369_v49 = vld [vmem:[%s7116_s3 + $0x138] sm:$0xff]  }
  0x18   :  { %4347 = vmatprep.subr.bf16.mxu0 %v5332_v24  ;;  %v4087_v10 = vcombine.high %v99_v7, %v107_v9  ;;  %v5356_v16 = vld [vmem:[%s7116_s3 + $0x160] sm:$0xff]   ;;  %v115_v18 = vld [vmem:[%s7113_s0 + $0x208] sm:$0xff]  ;;  %v4101_v20 = vcombine.high %v114_v14, %v122_v15  ;;  %v4100_v31 = vcombine.low %v114_v14, %v122_v15  ;;  %v5370_v50 = vld [vmem:[%s7116_s3 + $0x1f8] sm:$0xff]  }
  0x19   :  { %4410 = vmatpush3.bf16.msra.mxu1 %v5331_v23  ;;  %v123_v19 = vld [vmem:[%s7113_s0 + $0x248] sm:$0xff]  ;;  %v5357_v21 = vld [vmem:[%s7116_s3 + $0x120] sm:$0xff]   ;;  %v4086_v23 = vcombine.low %v99_v7, %v107_v9  ;;  %v53_v3 = vld [vmem:[%s7113_s0 + $0x18] sm:$0xff] }
  0x1a   :  { %4411 = vmatprep.subr.bf16.mxu1 %v5334_v26  ;;  %v5358_v22 = vld [vmem:[%s7116_s3 + $0x1e0] sm:$0xff]   ;;  %v5363_v32 = vld [vmem:[%s7116_s3 + $0x1a8] sm:$0xff]   ;;  %v4102_v37 = vcombine.low %v115_v18, %v123_v19  ;;  %v76_v9 = vld [vmem:[%s7113_s0 + $0xd0] sm:$0xff] }
  0x1b   :  { %4348 = vmatpush3.bf16.msra.mxu0 %v5333_v25  ;;  %v5359_v24 = vld [vmem:[%s7116_s3 + $0x1a0] sm:$0xff]   ;;  %v4103_v25 = vcombine.high %v115_v18, %v123_v19  ;;  %v131_v34 = vld [vmem:[%s7113_s0 + $0x288] sm:$0xff]  ;;  %v77_v14 = vld [vmem:[%s7113_s0 + $0xd8] sm:$0xff] }
  0x1c   :  { %4349 = vmatprep.subr.bf16.mxu0 %v5336_v28  ;;  %v130_v26 = vld [vmem:[%s7113_s0 + $0x280] sm:$0xff]  ;;  %v5360_v28 = vld [vmem:[%s7116_s3 + $0x168] sm:$0xff]  }
  0x1d   :  { %4412 = vmatpush3.bf16.msra.mxu1 %v5335_v27  ;;  %v138_v27 = vld [vmem:[%s7113_s0 + $0x2c0] sm:$0xff]  ;;  %v163_v60 = vld [vmem:[%s7113_s0 + $0x388] sm:$0xff] }
  0x1e   :  { %4413 = vmatprep.subr.bf16.mxu1 %v5338_v30  ;;  %v5362_v30 = vld [vmem:[%s7116_s3 + $0x1e8] sm:$0xff]   ;;  %v4116_v45 = vcombine.low %v130_v26, %v138_v27  ;;  %v170_v56 = vld [vmem:[%s7113_s0 + $0x3c0] sm:$0xff] }
  0x1f   :  { %4350 = vmatpush3.bf16.msra.mxu0 %v5337_v29  ;;  %v5361_v29 = vld [vmem:[%s7116_s3 + $0x128] sm:$0xff]   ;;  %v5374_v57 = vld [vmem:[%s7116_s3 + $0x2c0] sm:$0xff]  }
  0x20   :  { %4463 = vmatprep.subr.bf16.mxu0 %v5340_v36  ;;  %v5364_v36 = vld [vmem:[%s7116_s3 + $0x170] sm:$0xff]   ;;  %v171_v61 = vld [vmem:[%s7113_s0 + $0x3c8] sm:$0xff] }
  0x21   :  { %4414 = vmatpush3.bf16.msra.mxu1 %v5339_v35  ;;  %v139_v35 = vld [vmem:[%s7113_s0 + $0x2c8] sm:$0xff] }
  0x22   :  { %1840 = vmatmul.mubr.bf16.vlgmr.msra.gmra.mrb[0].mxu0 %v4036_v33  ;;  %4527 = vmatprep.subr.bf16.mxu1 %v5342_v42  ;;  %v4117_v33 = vcombine.high %v130_v26, %v138_v27  ;;  %v4119_v38 = vcombine.high %v131_v34, %v139_v35  ;;  %v154_v42 = vld [vmem:[%s7113_s0 + $0x340] sm:$0xff]  ;;  %v5376_v15 = vld [vmem:[%s7116_s3 + $0x248] sm:$0xff]   ;;  %v93_v27 = vld [vmem:[%s7113_s0 + $0x158] sm:$0xff] }
  0x23   :  { %4464 = vmatpush3.bf16.msra.mxu0 %v5341_v41  ;;  %1847 = vmatprep.mubr.bf16.mxu0 %v4053_v46  ;;  %v146_v41 = vld [vmem:[%s7113_s0 + $0x300] sm:$0xff]  ;;  %v147_v46 = vld [vmem:[%s7113_s0 + $0x308] sm:$0xff] }
  0x24   :  { %1937 = vmatmul.mubr.bf16.vlgmr.msra.gmra.mrb[0].mxu1 %v4038_v39  ;;  %4465 = vmatprep.subr.bf16.mxu0 %v5344_v47  ;;  %v5365_v39 = vld [vmem:[%s7116_s3 + $0x130] sm:$0xff]   ;;  %v155_v47 = vld [vmem:[%s7113_s0 + $0x348] sm:$0xff] }
  0x25   :  { %4528 = vmatpush3.bf16.msra.mxu1 %v5343_v43  ;;  %1944 = vmatprep.mubr.bf16.mxu1 %v4055_v51  ;;  %v5367_v43 = vld [vmem:[%s7116_s3 + $0x1b0] sm:$0xff]   ;;  %v4118_v51 = vcombine.low %v131_v34, %v139_v35  ;;  %v5377_v19 = vld [vmem:[%s7116_s3 + $0x208] sm:$0xff]  }
  0x26   :  { %4529 = vmatprep.subr.bf16.mxu1 %v5346_v53  ;;  %v4135_v53 = vcombine.high %v147_v46, %v155_v47  ;;  %v100_v35 = vld [vmem:[%s7113_s0 + $0x190] sm:$0xff] }
  0x27   :  { %4466 = vmatpush3.bf16.msra.mxu0 %v5345_v52  ;;  %v5371_v52 = vld [vmem:[%s7116_s3 + $0x1b8] sm:$0xff]  }
  0x28   :  { %4467 = vmatprep.subr.bf16.mxu0 %v5348_v59 }
  0x29   :  { %4530 = vmatpush3.bf16.msra.mxu1 %v5347_v55  ;;  %v5372_v55 = vld [vmem:[%s7116_s3 + $0x240] sm:$0xff]  }
  0x2a   :  { %1848 = vmatmul.mubr.bf16.gmra.mrb[4].mxu0 %v4052_v48  ;;  %4531 = vmatprep.subr.bf16.mxu1 %v5350_v0  ;;  %v4133_v48 = vcombine.high %v146_v41, %v154_v42  ;;  %v52_v0 = vld [vmem:[%s7113_s0 + $0x10] sm:$0xff] }
  0x2b   :  { %1855 = vmatprep.mubr.bf16.mxu0 %v4069_v58  ;;  %4468 = vmatpush3.bf16.msra.mxu0 %v5349_v63  ;;  %v4132_v58 = vcombine.low %v146_v41, %v154_v42  ;;  %v4151_v63 = vcombine.high %v163_v60, %v171_v61  ;;  %v5387_v42 = vld [vmem:[%s7116_s3 + $0x298] sm:$0xff]  }
  0x2c   :  { %1945 = vmatmul.mubr.bf16.gmra.mrb[4].mxu1 %v4054_v54  ;;  %4469 = vmatprep.subr.bf16.mxu0 %v5352_v6  ;;  %v162_v54 = vld [vmem:[%s7113_s0 + $0x380] sm:$0xff]  ;;  %v4150_v6 = vcombine.low %v163_v60, %v171_v61  ;;  %v5397_v61 = vld [vmem:[%s7116_s3 + $0x230] sm:$0xff]  }
  0x2d   :  { %1952 = vmatprep.mubr.bf16.mxu1 %v4071_v62  ;;  %4532 = vmatpush3.bf16.msra.mxu1 %v5351_v2  ;;  %v4149_v59 = vcombine.high %v162_v54, %v170_v56  ;;  %v4134_v62 = vcombine.low %v147_v46, %v155_v47  ;;  %v4148_v2 = vcombine.low %v162_v54, %v170_v56  ;;  %v5390_v46 = vld [vmem:[%s7116_s3 + $0x2e0] sm:$0xff]   ;;  %v5392_v47 = vld [vmem:[%s7116_s3 + $0x268] sm:$0xff]   ;;  %v124_v54 = vld [vmem:[%s7113_s0 + $0x250] sm:$0xff] }
  0x2e   :  { %4533 = vmatprep.subr.bf16.mxu1 %v5354_v12  ;;  %v117_v56 = vld [vmem:[%s7113_s0 + $0x218] sm:$0xff] }
  0x2f   :  { %4470 = vmatpush3.bf16.msra.mxu0 %v5353_v11  ;;  %v5373_v11 = vld [vmem:[%s7116_s3 + $0x200] sm:$0xff]  }
  0x30   :  { %4471 = vmatprep.subr.bf16.mxu0 %v5356_v16 }
  0x31   :  { %4534 = vmatpush3.bf16.msra.mxu1 %v5355_v13  ;;  %v69_v13 = vld [vmem:[%s7113_s0 + $0x98] sm:$0xff] }
  0x32   :  { %1856 = vmatmul.mubr.bf16.gmra.mrb[8].mxu0 %v4068_v1  ;;  %4535 = vmatprep.subr.bf16.mxu1 %v5358_v22  ;;  %v60_v1 = vld [vmem:[%s7113_s0 + $0x50] sm:$0xff]  ;;  %v4059_v18 = vcombine.high %v69_v13, %v77_v14 }
  0x33   :  { %1863 = vmatprep.mubr.bf16.mxu0 %v4085_v5  ;;  %4472 = vmatpush3.bf16.msra.mxu0 %v5357_v21  ;;  %v4041_v4 = vcombine.high %v52_v0, %v60_v1  ;;  %v61_v5 = vld [vmem:[%s7113_s0 + $0x58] sm:$0xff]  ;;  %v5379_v21 = vld [vmem:[%s7116_s3 + $0x288] sm:$0xff]   ;;  %v84_v22 = vld [vmem:[%s7113_s0 + $0x110] sm:$0xff] }
  0x34   :  { %1953 = vmatmul.mubr.bf16.gmra.mrb[8].mxu1 %v4070_v8  ;;  %4473 = vmatprep.subr.bf16.mxu0 %v5360_v28  ;;  %v4043_v7 = vcombine.high %v53_v3, %v61_v5  ;;  %v68_v8 = vld [vmem:[%s7113_s0 + $0x90] sm:$0xff]  ;;  %v4042_v16 = vcombine.low %v53_v3, %v61_v5  ;;  %v5401_v5 = vld [vmem:[%s7116_s3 + $0x238] sm:$0xff]  }
  0x35   :  { %1960 = vmatprep.mubr.bf16.mxu1 %v4087_v10  ;;  %4536 = vmatpush3.bf16.msra.mxu1 %v5359_v24  ;;  %v4040_v10 = vcombine.low %v52_v0, %v60_v1  ;;  %v4057_v12 = vcombine.high %v68_v8, %v76_v9  ;;  %v5380_v24 = vld [vmem:[%s7116_s3 + $0x250] sm:$0xff]   ;;  %v4056_v26 = vcombine.low %v68_v8, %v76_v9  ;;  %v133_v9 = vld [vmem:[%s7113_s0 + $0x298] sm:$0xff] }
  0x36   :  { %4537 = vmatprep.subr.bf16.mxu1 %v5362_v30  ;;  %v5381_v28 = vld [vmem:[%s7116_s3 + $0x210] sm:$0xff]  }
  0x37   :  { %4474 = vmatpush3.bf16.msra.mxu0 %v5361_v29  ;;  %v5382_v30 = vld [vmem:[%s7116_s3 + $0x2d0] sm:$0xff]  }
  0x38   :  { %4475 = vmatprep.subr.bf16.mxu0 %v5364_v36  ;;  %v108_v36 = vld [vmem:[%s7113_s0 + $0x1d0] sm:$0xff] }
  0x39   :  { %4538 = vmatpush3.bf16.msra.mxu1 %v5363_v32  ;;  %v4058_v32 = vcombine.low %v69_v13, %v77_v14  ;;  %v140_v3 = vld [vmem:[%s7113_s0 + $0x2d0] sm:$0xff] }
  0x3a   :  { %1864 = vmatmul.mubr.bf16.gmra.mrb[12].mxu0 %v4084_v17  ;;  %4539 = vmatprep.subr.bf16.mxu1 %v5366_v40  ;;  %v5375_v17 = vld [vmem:[%s7116_s3 + $0x280] sm:$0xff]   ;;  %v101_v40 = vld [vmem:[%s7113_s0 + $0x198] sm:$0xff] }
  0x3b   :  { %1871 = vmatprep.mubr.bf16.mxu0 %v4101_v20  ;;  %4476 = vmatpush3.bf16.msra.mxu0 %v5365_v39  ;;  %v5378_v20 = vld [vmem:[%s7116_s3 + $0x2c8] sm:$0xff]   ;;  %v5388_v39 = vld [vmem:[%s7116_s3 + $0x260] sm:$0xff]  }
  0x3c   :  { %1961 = vmatmul.mubr.bf16.gmra.mrb[12].mxu1 %v4086_v23  ;;  %4477 = vmatprep.subr.bf16.mxu0 %v5368_v44  ;;  %v92_v23 = vld [vmem:[%s7113_s0 + $0x150] sm:$0xff]  ;;  %v109_v44 = vld [vmem:[%s7113_s0 + $0x1d8] sm:$0xff] }
  0x3d   :  { %1968 = vmatprep.mubr.bf16.mxu1 %v4103_v25  ;;  %4540 = vmatpush3.bf16.msra.mxu1 %v5367_v43  ;;  %v85_v25 = vld [vmem:[%s7113_s0 + $0x118] sm:$0xff]  ;;  %v4073_v29 = vcombine.high %v84_v22, %v92_v23  ;;  %v4072_v41 = vcombine.low %v84_v22, %v92_v23  ;;  %v4089_v43 = vcombine.high %v100_v35, %v108_v36 }
  0x3e   :  { %4541 = vmatprep.subr.bf16.mxu1 %v5370_v50  ;;  %v4075_v34 = vcombine.high %v85_v25, %v93_v27  ;;  %v4091_v50 = vcombine.high %v101_v40, %v109_v44  ;;  %v4090_v0 = vcombine.low %v101_v40, %v109_v44  ;;  %v70_v40 = vld [vmem:[%s7113_s0 + $0xa0] sm:$0xff] }
  0x3f   :  { %4478 = vmatpush3.bf16.msra.mxu0 %v5369_v49  ;;  %v5391_v49 = vld [vmem:[%s7116_s3 + $0x2a0] sm:$0xff]  }
  0x40   :  { %4591 = vmatprep.subr.bf16.mxu0 %v5372_v55  ;;  %v5396_v55 = vld [vmem:[%s7116_s3 + $0x270] sm:$0xff]  }
  0x41   :  { %4542 = vmatpush3.bf16.msra.mxu1 %v5371_v52  ;;  %v5394_v52 = vld [vmem:[%s7116_s3 + $0x2e8] sm:$0xff]  }
  0x42   :  { %1872 = vmatmul.mubr.bf16.gmra.mrb[16].mxu0 %v4100_v31  ;;  %4655 = vmatprep.subr.bf16.mxu1 %v5374_v57  ;;  %v5384_v31 = vld [vmem:[%s7116_s3 + $0x258] sm:$0xff]   ;;  %v4088_v57 = vcombine.low %v100_v35, %v108_v36  ;;  %v55_v36 = vld [vmem:[%s7113_s0 + $0x28] sm:$0xff] }
  0x43   :  { %1879 = vmatprep.mubr.bf16.mxu0 %v4117_v33  ;;  %v5383_v33 = vld [vmem:[%s7116_s3 + $0x290] sm:$0xff]  }
  0x44   :  { %1969 = vmatmul.mubr.bf16.gmra.mrb[16].mxu1 %v4102_v37  ;;  %v5385_v37 = vld [vmem:[%s7116_s3 + $0x218] sm:$0xff]  }
  0x45   :  { %1976 = vmatprep.mubr.bf16.mxu1 %v4119_v38  ;;  %v5386_v38 = vld [vmem:[%s7116_s3 + $0x2d8] sm:$0xff]  }
  0x4a   :  { %1880 = vmatmul.mubr.bf16.gmra.mrb[20].mxu0 %v4116_v45  ;;  %v5389_v45 = vld [vmem:[%s7116_s3 + $0x220] sm:$0xff]  }
  0x4b   :  { %1887 = vmatprep.mubr.bf16.mxu0 %v4133_v48  ;;  %v4074_v48 = vcombine.low %v85_v25, %v93_v27  ;;  %v172_v25 = vld [vmem:[%s7113_s0 + $0x3d0] sm:$0xff]  ;;  %v165_v27 = vld [vmem:[%s7113_s0 + $0x398] sm:$0xff] }
  0x4c   :  { %1977 = vmatmul.mubr.bf16.gmra.mrb[20].mxu1 %v4118_v51  ;;  %v5393_v51 = vld [vmem:[%s7116_s3 + $0x228] sm:$0xff]  }
  0x4d   :  { %1984 = vmatprep.mubr.bf16.mxu1 %v4135_v53  ;;  %v116_v53 = vld [vmem:[%s7113_s0 + $0x210] sm:$0xff] }
  0x4e   :  { %v4105_v60 = vcombine.high %v116_v53, %v124_v54  ;;  %v4104_v8 = vcombine.low %v116_v53, %v124_v54 }
  0x52   :  { %1888 = vmatmul.mubr.bf16.gmra.mrb[24].mxu0 %v4132_v58  ;;  %v125_v58 = vld [vmem:[%s7113_s0 + $0x258] sm:$0xff] }
  0x53   :  { %1895 = vmatprep.mubr.bf16.mxu0 %v4149_v59  ;;  %v5395_v59 = vld [vmem:[%s7116_s3 + $0x2a8] sm:$0xff]   ;;  %v4107_v1 = vcombine.high %v117_v56, %v125_v58  ;;  %v4106_v13 = vcombine.low %v117_v56, %v125_v58 }
  0x54   :  { %1985 = vmatmul.mubr.bf16.gmra.mrb[24].mxu1 %v4134_v62  ;;  %v5398_v62 = vld [vmem:[%s7116_s3 + $0x2f0] sm:$0xff]  }
  0x55   :  { %1992 = vmatprep.mubr.bf16.mxu1 %v4151_v63  ;;  %v5400_v63 = vld [vmem:[%s7116_s3 + $0x278] sm:$0xff]  }
  0x5a   :  { %1896 = vmatmul.mubr.bf16.gmra.mrb[28].mxu0 %v4148_v2  ;;  %v132_v2 = vld [vmem:[%s7113_s0 + $0x290] sm:$0xff] }
  0x5b   :  { %2033 = vmatprep.mubr.bf16.mxu0 %v4041_v4  ;;  %v5399_v4 = vld [vmem:[%s7116_s3 + $0x2b0] sm:$0xff]  }
  0x5c   :  { %1993 = vmatmul.mubr.bf16.gmra.mrb[28].mxu1 %v4150_v6  ;;  %v5402_v6 = vld [vmem:[%s7116_s3 + $0x2f8] sm:$0xff]  }
  0x5d   :  { %2130 = vmatprep.mubr.bf16.mxu1 %v4043_v7  ;;  %v5404_v7 = vld [vmem:[%s7116_s3 + $0x340] sm:$0xff]  }
  0x62   :  { %2034 = vmatmul.mubr.bf16.vlgmr.msra.gmra.mrb[32].mxu0 %v4040_v10  ;;  %v5403_v10 = vld [vmem:[%s7116_s3 + $0x2b8] sm:$0xff]  }
  0x63   :  { %4592 = vmatpush3.bf16.msra.mxu0 %v5373_v11  ;;  %2041 = vmatprep.mubr.bf16.mxu0 %v4057_v12  ;;  %v4121_v11 = vcombine.high %v132_v2, %v140_v3  ;;  %v141_v12 = vld [vmem:[%s7113_s0 + $0x2d8] sm:$0xff] }
  0x64   :  { %4593 = vmatprep.subr.bf16.mxu0 %v5376_v15  ;;  %2131 = vmatmul.mubr.bf16.vlgmr.msra.gmra.mrb[32].mxu1 %v4042_v16  ;;  %v4123_v14 = vcombine.high %v133_v9, %v141_v12  ;;  %v148_v15 = vld [vmem:[%s7113_s0 + $0x310] sm:$0xff]  ;;  %v5506_v16 = vmov 0   ;;  %v4122_v22 = vcombine.low %v133_v9, %v141_v12 }
  0x65   :  { %4656 = vmatpush3.bf16.msra.mxu1 %v5375_v17  ;;  %2138 = vmatprep.mubr.bf16.mxu1 %v4059_v18  ;;  %v156_v17 = vld [vmem:[%s7113_s0 + $0x350] sm:$0xff]  ;;  %v4120_v18 = vcombine.low %v132_v2, %v140_v3 }
  0x66   :  { %4657 = vmatprep.subr.bf16.mxu1 %v5378_v20  ;;  %v149_v20 = vld [vmem:[%s7113_s0 + $0x318] sm:$0xff] }
  0x67   :  { %4594 = vmatpush3.bf16.msra.mxu0 %v5377_v19  ;;  %v4137_v19 = vcombine.high %v148_v15, %v156_v17 }
  0x68   :  { %4595 = vmatprep.subr.bf16.mxu0 %v5380_v24  ;;  %v164_v24 = vld [vmem:[%s7113_s0 + $0x390] sm:$0xff] }
  0x69   :  { %4658 = vmatpush3.bf16.msra.mxu1 %v5379_v21  ;;  %v157_v21 = vld [vmem:[%s7113_s0 + $0x358] sm:$0xff] }
  0x6a   :  { %2042 = vmatmul.mubr.bf16.gmra.mrb[36].mxu0 %v4056_v26  ;;  %4659 = vmatprep.subr.bf16.mxu1 %v5382_v30  ;;  %v4139_v23 = vcombine.high %v149_v20, %v157_v21  ;;  %v4136_v26 = vcombine.low %v148_v15, %v156_v17  ;;  %v4138_v30 = vcombine.low %v149_v20, %v157_v21 }
  0x6b   :  { %2049 = vmatprep.mubr.bf16.mxu0 %v4073_v29  ;;  %4596 = vmatpush3.bf16.msra.mxu0 %v5381_v28  ;;  %v4153_v28 = vcombine.high %v164_v24, %v172_v25  ;;  %v173_v29 = vld [vmem:[%s7113_s0 + $0x3d8] sm:$0xff] }
  0x6c   :  { %4597 = vmatprep.subr.bf16.mxu0 %v5384_v31  ;;  %2139 = vmatmul.mubr.bf16.gmra.mrb[36].mxu1 %v4058_v32  ;;  %v4155_v31 = vcombine.high %v165_v27, %v173_v29  ;;  %v54_v32 = vld [vmem:[%s7113_s0 + $0x20] sm:$0xff] }
  0x6d   :  { %2146 = vmatprep.mubr.bf16.mxu1 %v4075_v34  ;;  %4660 = vmatpush3.bf16.msra.mxu1 %v5383_v33  ;;  %v62_v33 = vld [vmem:[%s7113_s0 + $0x60] sm:$0xff]  ;;  %v4152_v34 = vcombine.low %v164_v24, %v172_v25 }
  0x6e   :  { %4661 = vmatprep.subr.bf16.mxu1 %v5386_v38  ;;  %v4045_v35 = vcombine.high %v54_v32, %v62_v33  ;;  %v4154_v38 = vcombine.low %v165_v27, %v173_v29 }
  0x6f   :  { %4598 = vmatpush3.bf16.msra.mxu0 %v5385_v37  ;;  %v63_v37 = vld [vmem:[%s7113_s0 + $0x68] sm:$0xff] }
  0x70   :  { %4599 = vmatprep.subr.bf16.mxu0 %v5388_v39  ;;  %v4047_v39 = vcombine.high %v55_v36, %v63_v37 }
  0x71   :  { %4662 = vmatpush3.bf16.msra.mxu1 %v5387_v42  ;;  %v4044_v42 = vcombine.low %v54_v32, %v62_v33 }
  0x72   :  { %2050 = vmatmul.mubr.bf16.gmra.mrb[40].mxu0 %v4072_v41  ;;  %4663 = vmatprep.subr.bf16.mxu1 %v5390_v46  ;;  %v78_v41 = vld [vmem:[%s7113_s0 + $0xe0] sm:$0xff]  ;;  %v79_v46 = vld [vmem:[%s7113_s0 + $0xe8] sm:$0xff] }
  0x73   :  { %2057 = vmatprep.mubr.bf16.mxu0 %v4089_v43  ;;  %4600 = vmatpush3.bf16.msra.mxu0 %v5389_v45  ;;  %v5405_v43 = vld [vmem:[%s7116_s3 + $0x300] sm:$0xff]   ;;  %v4061_v44 = vcombine.high %v70_v40, %v78_v41  ;;  %v71_v45 = vld [vmem:[%s7113_s0 + $0xa8] sm:$0xff] }
  0x74   :  { %4601 = vmatprep.subr.bf16.mxu0 %v5392_v47  ;;  %2147 = vmatmul.mubr.bf16.gmra.mrb[40].mxu1 %v4074_v48  ;;  %v5407_v47 = vld [vmem:[%s7116_s3 + $0x348] sm:$0xff]   ;;  %v4046_v48 = vcombine.low %v55_v36, %v63_v37 }
  0x75   :  { %2154 = vmatprep.mubr.bf16.mxu1 %v4091_v50  ;;  %4664 = vmatpush3.bf16.msra.mxu1 %v5391_v49  ;;  %v5406_v49 = vld [vmem:[%s7116_s3 + $0x380] sm:$0xff]   ;;  %v4063_v50 = vcombine.high %v71_v45, %v79_v46 }
  0x76   :  { %4665 = vmatprep.subr.bf16.mxu1 %v5394_v52 }
  0x77   :  { %4602 = vmatpush3.bf16.msra.mxu0 %v5393_v51  ;;  %v5408_v51 = vld [vmem:[%s7116_s3 + $0x308] sm:$0xff]  }
  0x78   :  { %4603 = vmatprep.subr.bf16.mxu0 %v5396_v55 }
  0x79   :  { %4666 = vmatpush3.bf16.msra.mxu1 %v5395_v59 }
  0x7a   :  { %2058 = vmatmul.mubr.bf16.gmra.mrb[44].mxu0 %v4088_v57  ;;  %4667 = vmatprep.subr.bf16.mxu1 %v5398_v62 }
  0x7b   :  { %2065 = vmatprep.mubr.bf16.mxu0 %v4105_v60  ;;  %4604 = vmatpush3.bf16.msra.mxu0 %v5397_v61 }
  0x7c   :  { %4605 = vmatprep.subr.bf16.mxu0 %v5400_v63  ;;  %2155 = vmatmul.mubr.bf16.gmra.mrb[44].mxu1 %v4090_v0 }
  0x7d   :  { %2162 = vmatprep.mubr.bf16.mxu1 %v4107_v1  ;;  %4668 = vmatpush3.bf16.msra.mxu1 %v5399_v4 }
  0x7e   :  { %4669 = vmatprep.subr.bf16.mxu1 %v5402_v6 }
  0x7f   :  { %4606 = vmatpush3.bf16.msra.mxu0 %v5401_v5 }
  0x80   :  { %4719 = vmatprep.subr.bf16.mxu0 %v5404_v7 }
  0x81   :  { %4670 = vmatpush3.bf16.msra.mxu1 %v5403_v10 }
  0x82   :  { %2066 = vmatmul.mubr.bf16.gmra.mrb[48].mxu0 %v4104_v8  ;;  %2486 = vmatprep.subr.bf16.mxu1 %v5506_v16 }
  0x83   :  { %2073 = vmatprep.mubr.bf16.mxu0 %v4121_v11 }
  0x84   :  { %2163 = vmatmul.mubr.bf16.gmra.mrb[48].mxu1 %v4106_v13 }
  0x85   :  { %2170 = vmatprep.mubr.bf16.mxu1 %v4123_v14 }
  0x8a   :  { %2074 = vmatmul.mubr.bf16.gmra.mrb[52].mxu0 %v4120_v18 }
  0x8b   :  { %2081 = vmatprep.mubr.bf16.mxu0 %v4137_v19 }
  0x8c   :  { %2171 = vmatmul.mubr.bf16.gmra.mrb[52].mxu1 %v4122_v22 }
  0x8d   :  { %2178 = vmatprep.mubr.bf16.mxu1 %v4139_v23 }
  0x92   :  { %2082 = vmatmul.mubr.bf16.gmra.mrb[56].mxu0 %v4136_v26 }
  0x93   :  { %2089 = vmatprep.mubr.bf16.mxu0 %v4153_v28 }
  0x94   :  { %2179 = vmatmul.mubr.bf16.gmra.mrb[56].mxu1 %v4138_v30 }
  0x95   :  { %2186 = vmatprep.mubr.bf16.mxu1 %v4155_v31 }
  0x9a   :  { %2090 = vmatmul.mubr.bf16.gmra.mrb[60].mxu0 %v4152_v34 }
  0x9b   :  { %2227 = vmatprep.mubr.bf16.mxu0 %v4045_v35 }
  0x9c   :  { %2187 = vmatmul.mubr.bf16.gmra.mrb[60].mxu1 %v4154_v38 }
  0x9d   :  { %2324 = vmatprep.mubr.bf16.mxu1 %v4047_v39 }
  0xa2   :  { %2228 = vmatmul.mubr.bf16.vlgmr.msra.gmra.mrb[64].mxu0 %v4044_v42 }
  0xa3   :  { %4720 = vmatpush3.bf16.msra.mxu0 %v5405_v43  ;;  %2235 = vmatprep.mubr.bf16.mxu0 %v4061_v44 }
  0xa4   :  { %17 = vsyncpa [#allocation3], 0  ;;  %4721 = vmatprep.subr.bf16.mxu0 %v5407_v47  ;;  %v86_v52 = vld [vmem:[%s7113_s0 + $0x120] sm:$0xff]  ;;  %v5410_v54 = vld [vmem:[%s7116_s3 + $0x350] sm:$0xff]   ;;  %2325 = vmatmul.mubr.bf16.vlgmr.msra.gmra.mrb[64].mxu1 %v4046_v48  ;;  %v4060_v55 = vcombine.low %v70_v40, %v78_v41  ;;  %v4062_v62 = vcombine.low %v71_v45, %v79_v46  ;;  %vm1782_vm0 = vcmask 130048   ;;  %s5510_s14 = smov [#allocation2]  }
  0xa5   :  { %v94_v53 = vld [vmem:[%s7113_s0 + $0x160] sm:$0xff]  ;;  %2487 = vmatpush1.bf16.msra.mxu1 %v5406_v49  ;;  %2332 = vmatprep.mubr.bf16.mxu1 %v4063_v50  ;;  %v5409_v56 = vld [vmem:[%s7116_s3 + $0x388] sm:$0xff]   ;;  %v5411_v60 = vld [vmem:[%s7116_s3 + $0x310] sm:$0xff]   ;;  %s4028_s15 = sshll.u32 %s5510_s14, 4  ;;  %s4029_s15 = int_to_ptr.vmem [resolvable:$true] %s4028_s15 }
  0xa6   :  { %2488 = vmatprep.subr.bf16.mxu1 %v5506_v16  ;;  %v4077_v57 = vcombine.high %v86_v52, %v94_v53  ;;  %v87_v58 = vld [vmem:[%s7113_s0 + $0x128] sm:$0xff]  ;;  %v5413_v61 = vld [vmem:[%s7116_s3 + $0x358] sm:$0xff]   ;;  %v5412_v0 = vld [vmem:[%s7116_s3 + $0x390] sm:$0xff]   ;;  %v4076_v5 = vcombine.low %v86_v52, %v94_v53  ;;  %s5482_s16 = scalar_lea.vmem %s4029_s15, 32  ;;  %p5487_p1 = scmp.lt.s32.totalorder %s4029_s15, %s4029_s15 }
  0xa7   :  { %4722 = vmatpush3.bf16.msra.mxu0 %v5408_v51  ;;  %v95_v59 = vld [vmem:[%s7113_s0 + $0x168] sm:$0xff]  ;;  %v5414_v1 = vld [vmem:[%s7116_s3 + $0x318] sm:$0xff]   ;;  %v102_v2 = vld [vmem:[%s7113_s0 + $0x1a0] sm:$0xff]  ;;  %p5483_p0 = scmp.ne.s32.totalorder %s4029_s15, %s5482_s16  ;;  %p5488_p2 = scmp.lt.s32.totalorder %s5482_s16, %s5482_s16 }
  0xa8   :  { %4723 = vmatprep.subr.bf16.mxu0 %v5410_v54  ;;  %v4079_v63 = vcombine.high %v87_v58, %v95_v59  ;;  %v110_v3 = vld [vmem:[%s7113_s0 + $0x1e0] sm:$0xff]  ;;  %v5415_v6 = vld [vmem:[%s7116_s3 + $0x398] sm:$0xff]   ;;  %v103_v8 = vld [vmem:[%s7113_s0 + $0x1a8] sm:$0xff]  ;;  %v4078_v12 = vcombine.low %v87_v58, %v95_v59 }
  0xa9   :  { %2489 = vmatpush1.bf16.msra.mxu1 %v5409_v56  ;;  %v5416_v4 = vld [vmem:[%s7116_s3 + $0x360] sm:$0xff]   ;;  %v4093_v7 = vcombine.high %v102_v2, %v110_v3  ;;  %v111_v9 = vld [vmem:[%s7113_s0 + $0x1e8] sm:$0xff]  ;;  %v5422_v19 = vld [vmem:[%s7116_s3 + $0x370] sm:$0xff]   ;;  %v4092_v20 = vcombine.low %v102_v2, %v110_v3  ;;  %p5489_p3 = por %p5488_p2, %p5487_p1 }
  0xaa   :  { %2236 = vmatmul.mubr.bf16.gmra.mrb[68].mxu0 %v4060_v55  ;;  %2490 = vmatprep.subr.bf16.mxu1 %v5506_v16  ;;  %v5417_v10 = vld [vmem:[%s7116_s3 + $0x320] sm:$0xff]   ;;  %v5419_v11 = vld [vmem:[%s7116_s3 + $0x368] sm:$0xff]   ;;  %v4095_v13 = vcombine.high %v103_v8, %v111_v9  ;;  %v5423_v25 = vld [vmem:[%s7116_s3 + $0x330] sm:$0xff]   ;;  %v4094_v26 = vcombine.low %v103_v8, %v111_v9 }
  0xab   :  { %2243 = vmatprep.mubr.bf16.mxu0 %v4077_v57  ;;  %4724 = vmatpush3.bf16.msra.mxu0 %v5411_v60  ;;  %v5418_v14 = vld [vmem:[%s7116_s3 + $0x3a0] sm:$0xff]   ;;  %v5420_v15 = vld [vmem:[%s7116_s3 + $0x328] sm:$0xff]   ;;  %v5425_v27 = vld [vmem:[%s7116_s3 + $0x378] sm:$0xff]   ;;  %p5490_p4 = pnand %p5489_p3, %p5483_p0 }
  0xac   :  { %4725 = vmatprep.subr.bf16.mxu0 %v5413_v61  ;;  %2333 = vmatmul.mubr.bf16.gmra.mrb[68].mxu1 %v4062_v62  ;;  %v118_v17 = vld [vmem:[%s7113_s0 + $0x220] sm:$0xff]  ;;  %v5421_v21 = vld [vmem:[%s7116_s3 + $0x3a8] sm:$0xff]   ;;  %v5424_v29 = vld [vmem:[%s7116_s3 + $0x3b0] sm:$0xff]  }
  0xad   :  { %2340 = vmatprep.mubr.bf16.mxu1 %v4079_v63  ;;  %2491 = vmatpush1.bf16.msra.mxu1 %v5412_v0  ;;  %v126_v18 = vld [vmem:[%s7113_s0 + $0x260] sm:$0xff]  ;;  %v119_v23 = vld [vmem:[%s7113_s0 + $0x228] sm:$0xff]  ;;  %v5427_v32 = vld [vmem:[%s7116_s3 + $0x338] sm:$0xff]  }
  0xae   :  { %2492 = vmatprep.subr.bf16.mxu1 %v5506_v16  ;;  %v4109_v22 = vcombine.high %v118_v17, %v126_v18  ;;  %v127_v24 = vld [vmem:[%s7113_s0 + $0x268] sm:$0xff]  ;;  %v134_v30 = vld [vmem:[%s7113_s0 + $0x2a0] sm:$0xff]  ;;  %v4108_v33 = vcombine.low %v118_v17, %v126_v18  ;;  %v5426_v34 = vld [vmem:[%s7116_s3 + $0x3b8] sm:$0xff]  }
  0xaf   :  { %4726 = vmatpush3.bf16.msra.mxu0 %v5414_v1  ;;  %v4111_v28 = vcombine.high %v119_v23, %v127_v24  ;;  %v142_v31 = vld [vmem:[%s7113_s0 + $0x2e0] sm:$0xff]  ;;  %v135_v36 = vld [vmem:[%s7113_s0 + $0x2a8] sm:$0xff]  ;;  %v4110_v38 = vcombine.low %v119_v23, %v127_v24  ;;  %v56_v56 = vld [vmem:[%s7113_s0 + $0x30] sm:$0xff] }
  0xb0   :  { %4727 = vmatprep.subr.bf16.mxu0 %v5416_v4  ;;  %v4125_v35 = vcombine.high %v134_v30, %v142_v31  ;;  %v143_v37 = vld [vmem:[%s7113_s0 + $0x2e8] sm:$0xff]  ;;  %v5428_v40 = vld [vmem:[%s7116_s3 + $0x3c0] sm:$0xff]   ;;  %v4124_v43 = vcombine.low %v134_v30, %v142_v31  ;;  %v64_v57 = vld [vmem:[%s7113_s0 + $0x70] sm:$0xff] }
  0xb1   :  { %2493 = vmatpush1.bf16.msra.mxu1 %v5415_v6  ;;  %v4127_v39 = vcombine.high %v135_v36, %v143_v37  ;;  %v150_v41 = vld [vmem:[%s7113_s0 + $0x320] sm:$0xff]  ;;  %v151_v45 = vld [vmem:[%s7113_s0 + $0x328] sm:$0xff]  ;;  %v4126_v46 = vcombine.low %v135_v36, %v143_v37  ;;  %v4049_v59 = vcombine.high %v56_v56, %v64_v57  ;;  %v57_v60 = vld [vmem:[%s7113_s0 + $0x38] sm:$0xff]  ;;  %v4048_v2 = vcombine.low %v56_v56, %v64_v57 }
  0xb2   :  { %2244 = vmatmul.mubr.bf16.gmra.mrb[72].mxu0 %v4076_v5  ;;  %2494 = vmatprep.subr.bf16.mxu1 %v5506_v16  ;;  %v158_v42 = vld [vmem:[%s7113_s0 + $0x360] sm:$0xff]  ;;  %v167_v52 = vld [vmem:[%s7113_s0 + $0x3a8] sm:$0xff]  ;;  %v65_v61 = vld [vmem:[%s7113_s0 + $0x78] sm:$0xff] }
  0xb3   :  { %2251 = vmatprep.mubr.bf16.mxu0 %v4093_v7  ;;  %4728 = vmatpush3.bf16.msra.mxu0 %v5417_v10  ;;  %v4141_v44 = vcombine.high %v150_v41, %v158_v42  ;;  %v166_v48 = vld [vmem:[%s7113_s0 + $0x3a0] sm:$0xff]  ;;  %v4140_v50 = vcombine.low %v150_v41, %v158_v42  ;;  %v175_v53 = vld [vmem:[%s7113_s0 + $0x3e8] sm:$0xff]  ;;  %v4051_v63 = vcombine.high %v57_v60, %v65_v61  ;;  %v72_v0 = vld [vmem:[%s7113_s0 + $0xb0] sm:$0xff] }
  0xb4   :  { %4729 = vmatprep.subr.bf16.mxu0 %v5419_v11  ;;  %2341 = vmatmul.mubr.bf16.gmra.mrb[72].mxu1 %v4078_v12  ;;  %v174_v49 = vld [vmem:[%s7113_s0 + $0x3e0] sm:$0xff]  ;;  %v4159_v55 = vcombine.high %v167_v52, %v175_v53  ;;  %v4158_v62 = vcombine.low %v167_v52, %v175_v53  ;;  %v80_v1 = vld [vmem:[%s7113_s0 + $0xf0] sm:$0xff]  ;;  %v73_v4 = vld [vmem:[%s7113_s0 + $0xb8] sm:$0xff]  ;;  %v4050_v6 = vcombine.low %v57_v60, %v65_v61 }
  0xb5   :  { %2348 = vmatprep.mubr.bf16.mxu1 %v4095_v13  ;;  %2495 = vmatpush1.bf16.msra.mxu1 %v5418_v14  ;;  %v4157_v51 = vcombine.high %v166_v48, %v174_v49  ;;  %v4156_v58 = vcombine.low %v166_v48, %v174_v49  ;;  %v4065_v3 = vcombine.high %v72_v0, %v80_v1  ;;  %v81_v5 = vld [vmem:[%s7113_s0 + $0xf8] sm:$0xff]  ;;  %v88_v8 = vld [vmem:[%s7113_s0 + $0x130] sm:$0xff] }
  0xb6   :  { %2496 = vmatprep.subr.bf16.mxu1 %v5506_v16  ;;  %v4067_v7 = vcombine.high %v73_v4, %v81_v5  ;;  %v96_v9 = vld [vmem:[%s7113_s0 + $0x170] sm:$0xff]  ;;  %v4064_v10 = vcombine.low %v72_v0, %v80_v1  ;;  %v89_v12 = vld [vmem:[%s7113_s0 + $0x138] sm:$0xff]  ;;  %v4066_v14 = vcombine.low %v73_v4, %v81_v5 }
  0xb7   :  { %4730 = vmatpush3.bf16.msra.mxu0 %v5420_v15  ;;  %v4081_v11 = vcombine.high %v88_v8, %v96_v9  ;;  %v97_v13 = vld [vmem:[%s7113_s0 + $0x178] sm:$0xff]  ;;  %v420_v15 = vlaneseq  ;;  %v104_v18 = vld [vmem:[%s7113_s0 + $0x1b0] sm:$0xff] }
  0xb8   :  { %4731 = vmatprep.subr.bf16.mxu0 %v5422_v19  ;;  %v4083_v17 = vcombine.high %v89_v12, %v97_v13  ;;  %v112_v19 = vld [vmem:[%s7113_s0 + $0x1f0] sm:$0xff]  ;;  %v105_v23 = vld [vmem:[%s7113_s0 + $0x1b8] sm:$0xff] }
  0xb9   :  { %2497 = vmatpush1.bf16.msra.mxu1 %v5421_v21  ;;  %v4080_v21 = vcombine.low %v88_v8, %v96_v9  ;;  %v113_v24 = vld [vmem:[%s7113_s0 + $0x1f8] sm:$0xff]  ;;  %v128_v30 = vld [vmem:[%s7113_s0 + $0x270] sm:$0xff] }
  0xba   :  { %2252 = vmatmul.mubr.bf16.gmra.mrb[76].mxu0 %v4092_v20  ;;  %2498 = vmatprep.subr.bf16.mxu1 %v5506_v16  ;;  %v6281_v20 = vshrl.u32 %v420_v15, 7  ;;  %v136_v52 = vld [vmem:[%s7113_s0 + $0x2b0] sm:$0xff]  ;;  %v137_v61 = vld [vmem:[%s7113_s0 + $0x2b8] sm:$0xff] }
  0xbb   :  { %2259 = vmatprep.mubr.bf16.mxu0 %v4109_v22  ;;  %4732 = vmatpush3.bf16.msra.mxu0 %v5423_v25  ;;  %v4097_v22 = vcombine.high %v104_v18, %v112_v19  ;;  %v4082_v25 = vcombine.low %v89_v12, %v97_v13  ;;  %v144_v53 = vld [vmem:[%s7113_s0 + $0x2f0] sm:$0xff] }
  0xbc   :  { %2349 = vmatmul.mubr.bf16.gmra.mrb[76].mxu1 %v4094_v26  ;;  %4733 = vmatprep.subr.bf16.mxu0 %v5425_v27  ;;  %v6291_v26 = vsub.s32 0, %v6281_v20  ;;  %v48_v27 = vld [vmem:[%s7117_s4 + $0x28] sm:$0x3]  ;;  %v4129_v60 = vcombine.high %v136_v52, %v144_v53  ;;  %v152_v12 = vld [vmem:[%s7113_s0 + $0x330] sm:$0xff] }
  0xbd   :  { %2356 = vmatprep.mubr.bf16.mxu1 %v4111_v28  ;;  %2499 = vmatpush1.bf16.msra.mxu1 %v5424_v29  ;;  %v4099_v28 = vcombine.high %v105_v23, %v113_v24  ;;  %v120_v29 = vld [vmem:[%s7113_s0 + $0x230] sm:$0xff] }
  0xbe   :  { %2500 = vmatprep.subr.bf16.mxu1 %v5506_v16  ;;  %v4113_v37 = vcombine.high %v120_v29, %v128_v30  ;;  %v4112_v57 = vcombine.low %v120_v29, %v128_v30  ;;  %v160_v13 = vld [vmem:[%s7113_s0 + $0x370] sm:$0xff] }
  0xbf   :  { %4734 = vmatpush3.bf16.msra.mxu0 %v5427_v32  ;;  %v6303_v32 = vrot.slane %v48_v27, %v6291_v26 }
  0xc1   :  { %2501 = vmatpush1.bf16.msra.mxu1 %v5426_v34  ;;  %v4096_v34 = vcombine.low %v104_v18, %v112_v19  ;;  %v4128_v19 = vcombine.low %v136_v52, %v144_v53 }
  0xc2   :  { %2260 = vmatmul.mubr.bf16.gmra.mrb[80].mxu0 %v4108_v33  ;;  %2502 = vmatprep.subr.bf16.mxu1 %v5506_v16  ;;  %v159_v16 = vld [vmem:[%s7113_s0 + $0x368] sm:$0xff] }
  0xc3   :  { %2267 = vmatprep.mubr.bf16.mxu0 %v4125_v35  ;;  %v4143_v47 = vcombine.high %v151_v45, %v159_v16  ;;  %v4142_v54 = vcombine.low %v151_v45, %v159_v16  ;;  %v4098_v45 = vcombine.low %v105_v23, %v113_v24  ;;  %v4145_v23 = vcombine.high %v152_v12, %v160_v13  ;;  %v153_v24 = vld [vmem:[%s7113_s0 + $0x338] sm:$0xff] }
  0xc4   :  { %2357 = vmatmul.mubr.bf16.gmra.mrb[80].mxu1 %v4110_v38  ;;  %v121_v38 = vld [vmem:[%s7113_s0 + $0x238] sm:$0xff] }
  0xc5   :  { %2364 = vmatprep.mubr.bf16.mxu1 %v4127_v39  ;;  %2503 = vmatpush1.bf16.msra.mxu1 %v5428_v40  ;;  %v129_v39 = vld [vmem:[%s7113_s0 + $0x278] sm:$0xff] }
  0xc6   :  { %v4114_v4 = vcombine.low %v121_v38, %v129_v39 }
  0xca   :  { %2268 = vmatmul.mubr.bf16.gmra.mrb[84].mxu0 %v4124_v43 }
  0xcb   :  { %2275 = vmatprep.mubr.bf16.mxu0 %v4141_v44 }
  0xcc   :  { %2365 = vmatmul.mubr.bf16.gmra.mrb[84].mxu1 %v4126_v46 }
  0xcd   :  { %2372 = vmatprep.mubr.bf16.mxu1 %v4143_v47  ;;  %v4115_v47 = vcombine.high %v121_v38, %v129_v39 }
  0xd2   :  { %2276 = vmatmul.mubr.bf16.gmra.mrb[88].mxu0 %v4140_v50 }
  0xd3   :  { %2283 = vmatprep.mubr.bf16.mxu0 %v4157_v51 }
  0xd4   :  { %2373 = vmatmul.mubr.bf16.gmra.mrb[88].mxu1 %v4142_v54 }
  0xd5   :  { %2380 = vmatprep.mubr.bf16.mxu1 %v4159_v55 }
  0xda   :  { %2284 = vmatmul.mubr.bf16.gmra.mrb[92].mxu0 %v4156_v58 }
  0xdb   :  { %2421 = vmatprep.mubr.bf16.mxu0 %v4049_v59 }
  0xdc   :  { %2381 = vmatmul.mubr.bf16.gmra.mrb[92].mxu1 %v4158_v62  ;;  %v145_v62 = vld [vmem:[%s7113_s0 + $0x2f8] sm:$0xff] }
  0xdd   :  { %4285 = vmatprep.mubr.msk.bf16.mxu1 %vm1782_vm0, %v4051_v63 }
  0xe2   :  { %2422 = vmatmul.mubr.bf16.vlgmr.msra.gmra.mrb[96].mxu0 %v4048_v2 }
  0xe3   :  { %2429 = vmatprep.mubr.bf16.mxu0 %v4065_v3 }
  0xe4   :  { %2519 = vmatmul.mubr.bf16.vlgmr.msra.gmra.mrb[96].mxu1 %v4050_v6 }
  0xe5   :  { %4286 = vmatprep.mubr.msk.bf16.mxu1 %vm1782_vm0, %v4067_v7  ;;  %v4131_v7 = vcombine.high %v137_v61, %v145_v62 }
  0xea   :  { %2430 = vmatmul.mubr.bf16.gmra.mrb[100].mxu0 %v4064_v10 }
  0xeb   :  { %2437 = vmatprep.mubr.bf16.mxu0 %v4081_v11 }
  0xec   :  { %2527 = vmatmul.mubr.bf16.gmra.mrb[100].mxu1 %v4066_v14 }
  0xed   :  { %4287 = vmatprep.mubr.msk.bf16.mxu1 %vm1782_vm0, %v4083_v17 }
  0xf2   :  { %2438 = vmatmul.mubr.bf16.gmra.mrb[104].mxu0 %v4080_v21 }
  0xf3   :  { %2445 = vmatprep.mubr.bf16.mxu0 %v4097_v22 }
  0xf4   :  { %2535 = vmatmul.mubr.bf16.gmra.mrb[104].mxu1 %v4082_v25  ;;  %v161_v25 = vld [vmem:[%s7113_s0 + $0x378] sm:$0xff] }
  0xf5   :  { %v4351_v31 = vpop.f32.mrb[0].mxu0  ;;  %4288 = vmatprep.mubr.msk.bf16.mxu1 %vm1782_vm0, %v4099_v28 }
  0xf6   :  { %v4352_v33 = vpop.f32.mrb[1].mxu0 }
  0xf7   :  { %v4353_v35 = vadd.f32 %v4352_v33, %v4351_v31  ;;  %v4354_v36 = vpop.f32.mrb[2].mxu0  ;;  %v4415_v40 = vpop.f32.mrb[0].mxu1  ;;  %v4130_v33 = vcombine.low %v137_v61, %v145_v62 }
  0xf8   :  { %v4355_v41 = vpop.f32.mrb[3].mxu0  ;;  %v4416_v44 = vpop.f32.mrb[1].mxu1 }
  0xf9   :  { %v1842_v42 = vadd.f32 %v4353_v35, %v6303_v32  ;;  %v4356_v43 = vadd.f32 %v4355_v41, %v4354_v36  ;;  %v4417_v16 = vadd.f32 %v4416_v44, %v4415_v40  ;;  %v4418_v46 = vpop.f32.mrb[2].mxu1  ;;  %v4147_v36 = vcombine.high %v153_v24, %v161_v25  ;;  %v168_v41 = vld [vmem:[%s7113_s0 + $0x3b0] sm:$0xff] }
  0xfa   :  { %2446 = vmatmul.mubr.bf16.gmra.mrb[108].mxu0 %v4096_v34  ;;  %v4419_v49 = vpop.f32.mrb[3].mxu1 }
  0xfb   :  { %v1845_v48 = vadd.f32 %v4356_v43, %v6303_v32  ;;  %2453 = vmatprep.mubr.bf16.mxu0 %v4113_v37  ;;  %v6314_v50 = vadd.f32 %v4417_v16, %v1842_v42  ;;  %v4420_v51 = vadd.f32 %v4419_v49, %v4418_v46  ;;  %v176_v42 = vld [vmem:[%s7113_s0 + $0x3f0] sm:$0xff]  ;;  %v4144_v16 = vcombine.low %v152_v12, %v160_v13  ;;  %v169_v49 = vld [vmem:[%s7113_s0 + $0x3b8] sm:$0xff] }
  0xfc   :  { %2543 = vmatmul.mubr.bf16.gmra.mrb[108].mxu1 %v4098_v45 }
  0xfd   :  { %v4357_v54 = vpop.f32.mrb[4].mxu0  ;;  %v6322_v55 = vadd.f32 %v4420_v51, %v1845_v48  ;;  %4289 = vmatprep.mubr.msk.bf16.mxu1 %vm1782_vm0, %v4115_v47  ;;  %v4161_v48 = vcombine.high %v168_v41, %v176_v42  ;;  %v177_v51 = vld [vmem:[%s7113_s0 + $0x3f8] sm:$0xff] }
  0xfe   :  { %v4358_v56 = vpop.f32.mrb[5].mxu0  ;;  %v4163_v61 = vcombine.high %v169_v49, %v177_v51 }
  0xff   :  { %v4359_v58 = vadd.f32 %v4358_v56, %v4357_v54  ;;  %v4360_v59 = vpop.f32.mrb[6].mxu0  ;;  %v4421_v63 = vpop.f32.mrb[4].mxu1 }
 0x100   :  { %v4361_v0 = vpop.f32.mrb[7].mxu0  ;;  %v4422_v3 = vpop.f32.mrb[5].mxu1 }
 0x101   :  { %v1850_v1 = vadd.f32 %v4359_v58, %v6303_v32  ;;  %v4362_v2 = vadd.f32 %v4361_v0, %v4360_v59  ;;  %v4423_v5 = vadd.f32 %v4422_v3, %v4421_v63  ;;  %v4424_v6 = vpop.f32.mrb[6].mxu1  ;;  %v4146_v58 = vcombine.low %v153_v24, %v161_v25 }
 0x102   :  { %2454 = vmatmul.mubr.bf16.gmra.mrb[112].mxu0 %v4112_v57  ;;  %v4425_v9 = vpop.f32.mrb[7].mxu1 }
 0x103   :  { %v1853_v8 = vadd.f32 %v4362_v2, %v6303_v32  ;;  %2461 = vmatprep.mubr.bf16.mxu0 %v4129_v60  ;;  %v6333_v10 = vadd.f32 %v4423_v5, %v1850_v1  ;;  %v4426_v11 = vadd.f32 %v4425_v9, %v4424_v6  ;;  %v4160_v5 = vcombine.low %v168_v41, %v176_v42 }
 0x104   :  { %2551 = vmatmul.mubr.bf16.gmra.mrb[112].mxu1 %v4114_v4 }
 0x105   :  { %v4363_v14 = vpop.f32.mrb[8].mxu0  ;;  %v6341_v17 = vadd.f32 %v4426_v11, %v1853_v8  ;;  %4290 = vmatprep.mubr.msk.bf16.mxu1 %vm1782_vm0, %v4131_v7 }
 0x106   :  { %v4364_v18 = vpop.f32.mrb[9].mxu0 }
 0x107   :  { %v4365_v21 = vadd.f32 %v4364_v18, %v4363_v14  ;;  %v4366_v22 = vpop.f32.mrb[10].mxu0  ;;  %v4427_v27 = vpop.f32.mrb[8].mxu1  ;;  %v4162_v14 = vcombine.low %v169_v49, %v177_v51 }
 0x108   :  { %v4367_v28 = vpop.f32.mrb[11].mxu0  ;;  %v4428_v31 = vpop.f32.mrb[9].mxu1 }
 0x109   :  { %v1858_v29 = vadd.f32 %v4365_v21, %v6303_v32  ;;  %v4368_v30 = vadd.f32 %v4367_v28, %v4366_v22  ;;  %v4429_v34 = vadd.f32 %v4428_v31, %v4427_v27  ;;  %v4430_v35 = vpop.f32.mrb[10].mxu1 }
 0x10a   :  { %2462 = vmatmul.mubr.bf16.gmra.mrb[116].mxu0 %v4128_v19  ;;  %v4431_v38 = vpop.f32.mrb[11].mxu1 }
 0x10b   :  { %v1861_v37 = vadd.f32 %v4368_v30, %v6303_v32  ;;  %2469 = vmatprep.mubr.bf16.mxu0 %v4145_v23  ;;  %v6352_v39 = vadd.f32 %v4429_v34, %v1858_v29  ;;  %v4432_v40 = vadd.f32 %v4431_v38, %v4430_v35 }
 0x10c   :  { %2559 = vmatmul.mubr.bf16.gmra.mrb[116].mxu1 %v4130_v33 }
 0x10d   :  { %v4369_v43 = vpop.f32.mrb[12].mxu0  ;;  %v6360_v44 = vadd.f32 %v4432_v40, %v1861_v37  ;;  %4291 = vmatprep.mubr.msk.bf16.mxu1 %vm1782_vm0, %v4147_v36 }
 0x10e   :  { %v4370_v45 = vpop.f32.mrb[13].mxu0 }
 0x10f   :  { %v4371_v46 = vadd.f32 %v4370_v45, %v4369_v43  ;;  %v4372_v47 = vpop.f32.mrb[14].mxu0  ;;  %v4433_v52 = vpop.f32.mrb[12].mxu1 }
 0x110   :  { %v4373_v53 = vpop.f32.mrb[15].mxu0  ;;  %v4434_v57 = vpop.f32.mrb[13].mxu1 }
 0x111   :  { %v1866_v54 = vadd.f32 %v4371_v46, %v6303_v32  ;;  %v4374_v56 = vadd.f32 %v4373_v53, %v4372_v47  ;;  %v4435_v59 = vadd.f32 %v4434_v57, %v4433_v52  ;;  %v4436_v60 = vpop.f32.mrb[14].mxu1 }
 0x112   :  { %2470 = vmatmul.mubr.bf16.gmra.mrb[120].mxu0 %v4144_v16  ;;  %v4437_v63 = vpop.f32.mrb[15].mxu1 }
 0x113   :  { %v1869_v62 = vadd.f32 %v4374_v56, %v6303_v32  ;;  %2477 = vmatprep.mubr.bf16.mxu0 %v4161_v48  ;;  %v6371_v0 = vadd.f32 %v4435_v59, %v1866_v54  ;;  %v4438_v1 = vadd.f32 %v4437_v63, %v4436_v60 }
 0x114   :  { %2567 = vmatmul.mubr.bf16.gmra.mrb[120].mxu1 %v4146_v58 }
 0x115   :  { %v4375_v2 = vpop.f32.mrb[16].mxu0  ;;  %v6373_v3 = vadd.f32 %v4438_v1, %v1869_v62  ;;  %4292 = vmatprep.mubr.msk.bf16.mxu1 %vm1782_vm0, %v4163_v61 }
 0x116   :  { %v4376_v4 = vpop.f32.mrb[17].mxu0 }
 0x117   :  { %v4377_v6 = vadd.f32 %v4376_v4, %v4375_v2  ;;  %v4378_v7 = vpop.f32.mrb[18].mxu0  ;;  %v4439_v8 = vpop.f32.mrb[16].mxu1 }
 0x118   :  { %v4379_v9 = vpop.f32.mrb[19].mxu0  ;;  %v4440_v13 = vpop.f32.mrb[17].mxu1 }
 0x119   :  { %v1874_v11 = vadd.f32 %v4377_v6, %v6303_v32  ;;  %v4380_v12 = vadd.f32 %v4379_v9, %v4378_v7  ;;  %v4441_v18 = vadd.f32 %v4440_v13, %v4439_v8  ;;  %v4442_v19 = vpop.f32.mrb[18].mxu1 }
 0x11a   :  { %2478 = vmatmul.mubr.bf16.gmra.mrb[124].mxu0 %v4160_v5  ;;  %v4443_v22 = vpop.f32.mrb[19].mxu1 }
 0x11b   :  { %v1877_v21 = vadd.f32 %v4380_v12, %v6303_v32  ;;  %v6378_v23 = vadd.f32 %v4441_v18, %v1874_v11  ;;  %v4444_v24 = vadd.f32 %v4443_v22, %v4442_v19 }
 0x11c   :  { %2575 = vmatmul.mubr.bf16.gmra.mrb[124].mxu1 %v4162_v14 }
 0x11d   :  { %v4381_v25 = vpop.f32.mrb[20].mxu0  ;;  %v6380_v27 = vadd.f32 %v4444_v24, %v1877_v21 }
 0x11e   :  { %v4382_v28 = vpop.f32.mrb[21].mxu0 }
 0x11f   :  { %v4383_v29 = vadd.f32 %v4382_v28, %v4381_v25  ;;  %v4384_v30 = vpop.f32.mrb[22].mxu0  ;;  %v4445_v31 = vpop.f32.mrb[20].mxu1 }
 0x120   :  { %v4385_v33 = vpop.f32.mrb[23].mxu0  ;;  %v4446_v36 = vpop.f32.mrb[21].mxu1 }
 0x121   :  { %v1882_v34 = vadd.f32 %v4383_v29, %v6303_v32  ;;  %v4386_v35 = vadd.f32 %v4385_v33, %v4384_v30  ;;  %v4447_v37 = vadd.f32 %v4446_v36, %v4445_v31  ;;  %v4448_v38 = vpop.f32.mrb[22].mxu1 }
 0x122   :  { %v4449_v41 = vpop.f32.mrb[23].mxu1 }
 0x123   :  { %v1885_v40 = vadd.f32 %v4386_v35, %v6303_v32  ;;  %v6384_v42 = vadd.f32 %v4447_v37, %v1882_v34  ;;  %v4450_v43 = vadd.f32 %v4449_v41, %v4448_v38 }
 0x125   :  { %v4387_v45 = vpop.f32.mrb[24].mxu0  ;;  %v6386_v16 = vadd.f32 %v4450_v43, %v1885_v40 }
 0x126   :  { %v4388_v46 = vpop.f32.mrb[25].mxu0 }
 0x127   :  { %v4389_v47 = vadd.f32 %v4388_v46, %v4387_v45  ;;  %v4390_v48 = vpop.f32.mrb[26].mxu0  ;;  %v4451_v49 = vpop.f32.mrb[24].mxu1 }
 0x128   :  { %v4391_v51 = vpop.f32.mrb[27].mxu0  ;;  %v4452_v54 = vpop.f32.mrb[25].mxu1 }
 0x129   :  { %v1890_v52 = vadd.f32 %v4389_v47, %v6303_v32  ;;  %v4392_v53 = vadd.f32 %v4391_v51, %v4390_v48  ;;  %v4453_v56 = vadd.f32 %v4452_v54, %v4451_v49  ;;  %v4454_v57 = vpop.f32.mrb[26].mxu1  ;;  %v2612_v48 = vld [vmem:[%s7118_s5 + $0x8] sm:$0xff] }
 0x12a   :  { %v4455_v59 = vpop.f32.mrb[27].mxu1 }
 0x12b   :  { %v1893_v58 = vadd.f32 %v4392_v53, %v6303_v32  ;;  %v6390_v60 = vadd.f32 %v4453_v56, %v1890_v52  ;;  %v4456_v61 = vadd.f32 %v4455_v59, %v4454_v57 }
 0x12d   :  { %v4393_v62 = vpop.f32.mrb[28].mxu0  ;;  %v6392_v63 = vadd.f32 %v4456_v61, %v1893_v58 }
 0x12e   :  { %v4394_v1 = vpop.f32.mrb[29].mxu0 }
 0x12f   :  { %v4395_v2 = vadd.f32 %v4394_v1, %v4393_v62  ;;  %v4396_v4 = vpop.f32.mrb[30].mxu0  ;;  %v4457_v5 = vpop.f32.mrb[28].mxu1 }
 0x130   :  { %v4397_v6 = vpop.f32.mrb[31].mxu0  ;;  %v4458_v9 = vpop.f32.mrb[29].mxu1 }
 0x131   :  { %v1898_v7 = vadd.f32 %v4395_v2, %v6303_v32  ;;  %v4398_v8 = vadd.f32 %v4397_v6, %v4396_v4  ;;  %v4459_v11 = vadd.f32 %v4458_v9, %v4457_v5  ;;  %v4460_v12 = vpop.f32.mrb[30].mxu1  ;;  %v2613_v6 = vld [vmem:[%s7118_s5 + $0x10] sm:$0xff] }
 0x132   :  { %v4461_v14 = vpop.f32.mrb[31].mxu1 }
 0x133   :  { %v1901_v13 = vadd.f32 %v4398_v8, %v6303_v32  ;;  %v6396_v18 = vadd.f32 %v4459_v11, %v1898_v7  ;;  %v4462_v19 = vadd.f32 %v4461_v14, %v4460_v12 }
 0x135   :  { %v4479_v21 = vpop.f32.mrb[32].mxu0  ;;  %v6398_v22 = vadd.f32 %v4462_v19, %v1901_v13 }
 0x136   :  { %v4480_v24 = vpop.f32.mrb[33].mxu0 }
 0x137   :  { %v4481_v25 = vadd.f32 %v4480_v24, %v4479_v21  ;;  %v4482_v28 = vpop.f32.mrb[34].mxu0  ;;  %v4543_v29 = vpop.f32.mrb[32].mxu1 }
 0x138   :  { %v4483_v30 = vpop.f32.mrb[35].mxu0  ;;  %v4544_v34 = vpop.f32.mrb[33].mxu1 }
 0x139   :  { %v2036_v31 = vadd.f32 %v4481_v25, %v6314_v50  ;;  %v4484_v33 = vadd.f32 %v4483_v30, %v4482_v28  ;;  %v4545_v35 = vadd.f32 %v4544_v34, %v4543_v29  ;;  %v4546_v36 = vpop.f32.mrb[34].mxu1  ;;  %v2611_v50 = vld [vmem:[%s7118_s5] sm:$0xff] }
 0x13a   :  { %v4547_v37 = vpop.f32.mrb[35].mxu1  ;;  %v5090_v51 = vpack.c.bf16 %v2612_v48, %v2611_v50 }
 0x13b   :  { %v2039_v32 = vadd.f32 %v4484_v33, %v6322_v55  ;;  %v6402_v38 = vadd.f32 %v4545_v35, %v2036_v31  ;;  %v4548_v40 = vadd.f32 %v4547_v37, %v4546_v36 }
 0x13c   :  { %5091 = vmatprep.subr.bf16.mxu0 %v5090_v51  ;;  %5284 = vmatprep.subr.bf16.mxu1 %v5090_v51 }
 0x13d   :  { %v4485_v41 = vpop.f32.mrb[36].mxu0  ;;  %v6404_v43 = vadd.f32 %v4548_v40, %v2039_v32  ;;  %5093 = vmatpush3.bf16.msra.mxu0 %v5090_v51  ;;  %5292 = vmatpush3.bf16.msra.mxu1 %v5090_v51 }
 0x13e   :  { %v4486_v45 = vpop.f32.mrb[37].mxu0 }
 0x13f   :  { %v4487_v46 = vadd.f32 %v4486_v45, %v4485_v41  ;;  %v4488_v47 = vpop.f32.mrb[38].mxu0  ;;  %v4549_v49 = vpop.f32.mrb[36].mxu1 }
 0x140   :  { %v4489_v55 = vpop.f32.mrb[39].mxu0  ;;  %v4550_v54 = vpop.f32.mrb[37].mxu1 }
 0x141   :  { %v2044_v52 = vadd.f32 %v4487_v46, %v6333_v10  ;;  %v4490_v53 = vadd.f32 %v4489_v55, %v4488_v47  ;;  %v4551_v56 = vadd.f32 %v4550_v54, %v4549_v49  ;;  %v4552_v57 = vpop.f32.mrb[38].mxu1 }
 0x142   :  { %v4553_v59 = vpop.f32.mrb[39].mxu1 }
 0x143   :  { %v2047_v58 = vadd.f32 %v4490_v53, %v6341_v17  ;;  %v6414_v61 = vadd.f32 %v4551_v56, %v2044_v52  ;;  %v4554_v62 = vadd.f32 %v4553_v59, %v4552_v57  ;;  %v2614_v17 = vld [vmem:[%s7118_s5 + $0x18] sm:$0xff]  ;;  %v2616_v59 = vld [vmem:[%s7118_s5 + $0x28] sm:$0xff] }
 0x144   :  { %v5094_v9 = vpack.c.bf16 %v2614_v17, %v2613_v6 }
 0x145   :  { %v4491_v1 = vpop.f32.mrb[40].mxu0  ;;  %v6416_v2 = vadd.f32 %v4554_v62, %v2047_v58 }
 0x146   :  { %v4492_v4 = vpop.f32.mrb[41].mxu0  ;;  %5095 = vmatprep.subr.bf16.mxu0 %v5094_v9  ;;  %5285 = vmatprep.subr.bf16.mxu1 %v5094_v9 }
 0x147   :  { %v4493_v5 = vadd.f32 %v4492_v4, %v4491_v1  ;;  %v4494_v10 = vpop.f32.mrb[42].mxu0  ;;  %v4555_v7 = vpop.f32.mrb[40].mxu1  ;;  %5097 = vmatpush3.bf16.msra.mxu0 %v5094_v9  ;;  %5293 = vmatpush3.bf16.msra.mxu1 %v5094_v9 }
 0x148   :  { %v4495_v8 = vpop.f32.mrb[43].mxu0  ;;  %v4556_v13 = vpop.f32.mrb[41].mxu1 }
 0x149   :  { %v2052_v11 = vadd.f32 %v4493_v5, %v6352_v39  ;;  %v4496_v12 = vadd.f32 %v4495_v8, %v4494_v10  ;;  %v4557_v14 = vadd.f32 %v4556_v13, %v4555_v7  ;;  %v4558_v19 = vpop.f32.mrb[42].mxu1 }
 0x14a   :  { %v4559_v24 = vpop.f32.mrb[43].mxu1 }
 0x14b   :  { %v2055_v21 = vadd.f32 %v4496_v12, %v6360_v44  ;;  %v6426_v25 = vadd.f32 %v4557_v14, %v2052_v11  ;;  %v4560_v28 = vadd.f32 %v4559_v24, %v4558_v19  ;;  %v2618_v24 = vld [vmem:[%s7118_s5 + $0x38] sm:$0xff] }
 0x14d   :  { %v4497_v29 = vpop.f32.mrb[44].mxu0  ;;  %v6428_v30 = vadd.f32 %v4560_v28, %v2055_v21  ;;  %v2617_v21 = vld [vmem:[%s7118_s5 + $0x30] sm:$0xff]  ;;  %v2619_v28 = vld [vmem:[%s7118_s5 + $0x40] sm:$0xff] }
 0x14e   :  { %v4498_v31 = vpop.f32.mrb[45].mxu0 }
 0x14f   :  { %v4499_v33 = vadd.f32 %v4498_v31, %v4497_v29  ;;  %v4500_v39 = vpop.f32.mrb[46].mxu0  ;;  %v4561_v34 = vpop.f32.mrb[44].mxu1 }
 0x150   :  { %v4501_v35 = vpop.f32.mrb[47].mxu0  ;;  %v4562_v37 = vpop.f32.mrb[45].mxu1 }
 0x151   :  { %v2060_v36 = vadd.f32 %v4499_v33, %v6371_v0  ;;  %v4502_v32 = vadd.f32 %v4501_v35, %v4500_v39  ;;  %v4563_v40 = vadd.f32 %v4562_v37, %v4561_v34  ;;  %v4564_v44 = vpop.f32.mrb[46].mxu1  ;;  %v2620_v33 = vld [vmem:[%s7118_s5 + $0x48] sm:$0xff] }
 0x152   :  { %v4565_v45 = vpop.f32.mrb[47].mxu1  ;;  %v5106_v35 = vpack.c.bf16 %v2620_v33, %v2619_v28 }
 0x153   :  { %v2063_v41 = vadd.f32 %v4502_v32, %v6373_v3  ;;  %v6432_v46 = vadd.f32 %v4563_v40, %v2060_v36  ;;  %v4566_v47 = vadd.f32 %v4565_v45, %v4564_v44  ;;  %v2615_v3 = vld [vmem:[%s7118_s5 + $0x20] sm:$0xff]  ;;  %v2621_v44 = vld [vmem:[%s7118_s5 + $0x50] sm:$0xff] }
 0x154   :  { %v5098_v4 = vpack.c.bf16 %v2616_v59, %v2615_v3 }
 0x155   :  { %v4503_v50 = vpop.f32.mrb[48].mxu0  ;;  %v6434_v48 = vadd.f32 %v4566_v47, %v2063_v41  ;;  %v2622_v41 = vld [vmem:[%s7118_s5 + $0x58] sm:$0xff] }
 0x156   :  { %v4504_v49 = vpop.f32.mrb[49].mxu0  ;;  %5099 = vmatprep.subr.bf16.mxu0 %v5098_v4  ;;  %5286 = vmatprep.subr.bf16.mxu1 %v5098_v4 }
 0x157   :  { %v4505_v55 = vadd.f32 %v4504_v49, %v4503_v50  ;;  %v4506_v51 = vpop.f32.mrb[50].mxu0  ;;  %v4567_v52 = vpop.f32.mrb[48].mxu1  ;;  %5101 = vmatpush3.bf16.msra.mxu0 %v5098_v4  ;;  %5294 = vmatpush3.bf16.msra.mxu1 %v5098_v4  ;;  %v5110_v50 = vpack.c.bf16 %v2622_v41, %v2621_v44 }
 0x158   :  { %v4507_v53 = vpop.f32.mrb[51].mxu0  ;;  %v4568_v56 = vpop.f32.mrb[49].mxu1 }
 0x159   :  { %v2068_v0 = vadd.f32 %v4505_v55, %v6378_v23  ;;  %v4508_v54 = vadd.f32 %v4507_v53, %v4506_v51  ;;  %v4569_v57 = vadd.f32 %v4568_v56, %v4567_v52  ;;  %v4570_v58 = vpop.f32.mrb[50].mxu1 }
 0x15a   :  { %v4571_v1 = vpop.f32.mrb[51].mxu1 }
 0x15b   :  { %v2071_v62 = vadd.f32 %v4508_v54, %v6380_v27  ;;  %v6444_v5 = vadd.f32 %v4569_v57, %v2068_v0  ;;  %v4572_v10 = vadd.f32 %v4571_v1, %v4570_v58 }
 0x15d   :  { %v4509_v23 = vpop.f32.mrb[52].mxu0  ;;  %v6446_v6 = vadd.f32 %v4572_v10, %v2071_v62 }
 0x15e   :  { %v4510_v17 = vpop.f32.mrb[53].mxu0 }
 0x15f   :  { %v4511_v7 = vadd.f32 %v4510_v17, %v4509_v23  ;;  %v4512_v8 = vpop.f32.mrb[54].mxu0  ;;  %v4573_v9 = vpop.f32.mrb[52].mxu1 }
 0x160   :  { %v4513_v11 = vpop.f32.mrb[55].mxu0  ;;  %v4574_v13 = vpop.f32.mrb[53].mxu1 }
 0x161   :  { %v2076_v12 = vadd.f32 %v4511_v7, %v6384_v42  ;;  %v4514_v27 = vadd.f32 %v4513_v11, %v4512_v8  ;;  %v4575_v14 = vadd.f32 %v4574_v13, %v4573_v9  ;;  %v4576_v19 = vpop.f32.mrb[54].mxu1  ;;  %v5102_v42 = vpack.c.bf16 %v2618_v24, %v2617_v21  ;;  %v2624_v13 = vld [vmem:[%s7118_s5 + $0x68] sm:$0xff] }
 0x162   :  { %v4577_v31 = vpop.f32.mrb[55].mxu1 }
 0x163   :  { %v2079_v29 = vadd.f32 %v4514_v27, %v6386_v16  ;;  %v6462_v39 = vadd.f32 %v4575_v14, %v2076_v12  ;;  %v4578_v34 = vadd.f32 %v4577_v31, %v4576_v19  ;;  %5103 = vmatprep.subr.bf16.mxu0 %v5102_v42  ;;  %5287 = vmatprep.subr.bf16.mxu1 %v5102_v42  ;;  %v2623_v27 = vld [vmem:[%s7118_s5 + $0x60] sm:$0xff]  ;;  %v2625_v31 = vld [vmem:[%s7118_s5 + $0x70] sm:$0xff] }
 0x164   :  { %5105 = vmatpush3.bf16.msra.mxu0 %v5102_v42  ;;  %5295 = vmatpush3.bf16.msra.mxu1 %v5102_v42  ;;  %v2626_v42 = vld [vmem:[%s7118_s5 + $0x78] sm:$0xff] }
 0x165   :  { %v4515_v36 = vpop.f32.mrb[56].mxu0  ;;  %v6464_v32 = vadd.f32 %v4578_v34, %v2079_v29  ;;  %5107 = vmatprep.subr.bf16.mxu0 %v5106_v35  ;;  %5288 = vmatprep.subr.bf16.mxu1 %v5106_v35 }
 0x166   :  { %v4516_v37 = vpop.f32.mrb[57].mxu0 }
 0x167   :  { %v4517_v40 = vadd.f32 %v4516_v37, %v4515_v36  ;;  %v4518_v16 = vpop.f32.mrb[58].mxu0  ;;  %v4579_v45 = vpop.f32.mrb[56].mxu1  ;;  %v5118_v36 = vpack.c.bf16 %v2626_v42, %v2625_v31 }
 0x168   :  { %v4519_v47 = vpop.f32.mrb[59].mxu0  ;;  %v4580_v51 = vpop.f32.mrb[57].mxu1  ;;  %5109 = vmatpush3.bf16.msra.mxu0 %v5106_v35  ;;  %5296 = vmatpush3.bf16.msra.mxu1 %v5106_v35 }
 0x169   :  { %v2084_v49 = vadd.f32 %v4517_v40, %v6390_v60  ;;  %v4520_v55 = vadd.f32 %v4519_v47, %v4518_v16  ;;  %v4581_v52 = vadd.f32 %v4580_v51, %v4579_v45  ;;  %v4582_v53 = vpop.f32.mrb[58].mxu1  ;;  %5111 = vmatprep.subr.bf16.mxu0 %v5110_v50  ;;  %5289 = vmatprep.subr.bf16.mxu1 %v5110_v50 }
 0x16a   :  { %v4583_v54 = vpop.f32.mrb[59].mxu1 }
 0x16b   :  { %v2087_v0 = vadd.f32 %v4520_v55, %v6392_v63  ;;  %v6474_v56 = vadd.f32 %v4581_v52, %v2084_v49  ;;  %v4584_v57 = vadd.f32 %v4583_v54, %v4582_v53 }
 0x16c   :  { %5113 = vmatpush3.bf16.msra.mxu0 %v5110_v50  ;;  %5297 = vmatpush3.bf16.msra.mxu1 %v5110_v50 }
 0x16d   :  { %v4521_v58 = vpop.f32.mrb[60].mxu0  ;;  %v6476_v3 = vadd.f32 %v4584_v57, %v2087_v0 }
 0x16e   :  { %v4522_v59 = vpop.f32.mrb[61].mxu0 }
 0x16f   :  { %v4523_v60 = vadd.f32 %v4522_v59, %v4521_v58  ;;  %v4524_v62 = vpop.f32.mrb[62].mxu0  ;;  %v4585_v1 = vpop.f32.mrb[60].mxu1 }
 0x170   :  { %v4525_v4 = vpop.f32.mrb[63].mxu0  ;;  %v4586_v63 = vpop.f32.mrb[61].mxu1 }
 0x171   :  { %v2092_v10 = vadd.f32 %v4523_v60, %v6396_v18  ;;  %v4526_v23 = vadd.f32 %v4525_v4, %v4524_v62  ;;  %v4587_v17 = vadd.f32 %v4586_v63, %v4585_v1  ;;  %v4588_v7 = vpop.f32.mrb[62].mxu1  ;;  %v5114_v18 = vpack.c.bf16 %v2624_v13, %v2623_v27 }
 0x172   :  { %v4589_v9 = vpop.f32.mrb[63].mxu1 }
 0x173   :  { %v2095_v8 = vadd.f32 %v4526_v23, %v6398_v22  ;;  %v6480_v11 = vadd.f32 %v4587_v17, %v2092_v10  ;;  %v4590_v12 = vadd.f32 %v4589_v9, %v4588_v7  ;;  %5115 = vmatprep.subr.bf16.mxu0 %v5114_v18  ;;  %5290 = vmatprep.subr.bf16.mxu1 %v5114_v18 }
 0x174   :  { %5117 = vmatpush3.bf16.msra.mxu0 %v5114_v18  ;;  %5298 = vmatpush3.bf16.msra.mxu1 %v5114_v18 }
 0x175   :  { %v4607_v14 = vpop.f32.mrb[64].mxu0  ;;  %v6488_v19 = vadd.f32 %v4590_v12, %v2095_v8  ;;  %5119 = vmatprep.subr.bf16.mxu0 %v5118_v36  ;;  %5291 = vmatprep.subr.bf16.mxu1 %v5118_v36 }
 0x176   :  { %v4608_v21 = vpop.f32.mrb[65].mxu0 }
 0x177   :  { %v4609_v24 = vadd.f32 %v4608_v21, %v4607_v14  ;;  %v4610_v28 = vpop.f32.mrb[66].mxu0  ;;  %v4671_v22 = vpop.f32.mrb[64].mxu1 }
 0x178   :  { %v4611_v29 = vpop.f32.mrb[67].mxu0  ;;  %v4672_v35 = vpop.f32.mrb[65].mxu1  ;;  %5121 = vmatpush3.bf16.msra.mxu0 %v5118_v36  ;;  %5299 = vmatpush3.bf16.msra.mxu1 %v5118_v36 }
 0x179   :  { %v2230_v33 = vadd.f32 %v4609_v24, %v6402_v38  ;;  %v4612_v34 = vadd.f32 %v4611_v29, %v4610_v28  ;;  %v4673_v37 = vadd.f32 %v4672_v35, %v4671_v22  ;;  %v4674_v40 = vpop.f32.mrb[66].mxu1 }
 0x17a   :  { %v4675_v44 = vpop.f32.mrb[67].mxu1 }
 0x17b   :  { %v2233_v16 = vadd.f32 %v4612_v34, %v6404_v43  ;;  %v6498_v41 = vadd.f32 %v4673_v37, %v2230_v33  ;;  %v4676_v45 = vadd.f32 %v4675_v44, %v4674_v40 }
 0x17d   :  { %v4613_v47 = vpop.f32.mrb[68].mxu0  ;;  %v6500_v50 = vadd.f32 %v4676_v45, %v2233_v16 }
 0x17e   :  { %v4614_v49 = vpop.f32.mrb[69].mxu0 }
 0x17f   :  { %v4615_v38 = vadd.f32 %v4614_v49, %v4613_v47  ;;  %v4616_v55 = vpop.f32.mrb[70].mxu0  ;;  %v4677_v51 = vpop.f32.mrb[68].mxu1 }
 0x180   :  { %v4617_v52 = vpop.f32.mrb[71].mxu0  ;;  %v4678_v43 = vpop.f32.mrb[69].mxu1 }
 0x181   :  { %v2238_v53 = vadd.f32 %v4615_v38, %v6414_v61  ;;  %v4618_v0 = vadd.f32 %v4617_v52, %v4616_v55  ;;  %v4679_v54 = vadd.f32 %v4678_v43, %v4677_v51  ;;  %v4680_v57 = vpop.f32.mrb[70].mxu1 }
 0x182   :  { %v4681_v59 = vpop.f32.mrb[71].mxu1 }
 0x183   :  { %v2241_v58 = vadd.f32 %v4618_v0, %v6416_v2  ;;  %v6504_v60 = vadd.f32 %v4679_v54, %v2238_v53  ;;  %v4682_v62 = vadd.f32 %v4681_v59, %v4680_v57 }
 0x185   :  { %v4619_v1 = vpop.f32.mrb[72].mxu0  ;;  %v6506_v4 = vadd.f32 %v4682_v62, %v2241_v58 }
 0x186   :  { %v4620_v10 = vpop.f32.mrb[73].mxu0 }
 0x187   :  { %v4621_v23 = vadd.f32 %v4620_v10, %v4619_v1  ;;  %v4622_v63 = vpop.f32.mrb[74].mxu0  ;;  %v4683_v17 = vpop.f32.mrb[72].mxu1 }
 0x188   :  { %v4623_v7 = vpop.f32.mrb[75].mxu0  ;;  %v4684_v9 = vpop.f32.mrb[73].mxu1 }
 0x189   :  { %v2246_v61 = vadd.f32 %v4621_v23, %v6426_v25  ;;  %v4624_v8 = vadd.f32 %v4623_v7, %v4622_v63  ;;  %v4685_v12 = vadd.f32 %v4684_v9, %v4683_v17  ;;  %v4686_v27 = vpop.f32.mrb[74].mxu1 }
 0x18a   :  { %v4687_v13 = vpop.f32.mrb[75].mxu1 }
 0x18b   :  { %v2249_v2 = vadd.f32 %v4624_v8, %v6428_v30  ;;  %v6510_v14 = vadd.f32 %v4685_v12, %v2246_v61  ;;  %v4688_v18 = vadd.f32 %v4687_v13, %v4686_v27 }
 0x18d   :  { %v4625_v21 = vpop.f32.mrb[76].mxu0  ;;  %v6512_v24 = vadd.f32 %v4688_v18, %v2249_v2 }
 0x18e   :  { %v4626_v28 = vpop.f32.mrb[77].mxu0 }
 0x18f   :  { %v4627_v22 = vadd.f32 %v4626_v28, %v4625_v21  ;;  %v4628_v29 = vpop.f32.mrb[78].mxu0  ;;  %v4689_v31 = vpop.f32.mrb[76].mxu1 }
 0x190   :  { %v4629_v42 = vpop.f32.mrb[79].mxu0  ;;  %v4690_v34 = vpop.f32.mrb[77].mxu1 }
 0x191   :  { %v2254_v25 = vadd.f32 %v4627_v22, %v6432_v46  ;;  %v4630_v33 = vadd.f32 %v4629_v42, %v4628_v29  ;;  %v4691_v35 = vadd.f32 %v4690_v34, %v4689_v31  ;;  %v4692_v36 = vpop.f32.mrb[78].mxu1 }
 0x192   :  { %v4693_v37 = vpop.f32.mrb[79].mxu1 }
 0x193   :  { %v2257_v30 = vadd.f32 %v4630_v33, %v6434_v48  ;;  %v6516_v40 = vadd.f32 %v4691_v35, %v2254_v25  ;;  %v4694_v16 = vadd.f32 %v4693_v37, %v4692_v36 }
 0x195   :  { %v4631_v44 = vpop.f32.mrb[80].mxu0  ;;  %v6518_v45 = vadd.f32 %v4694_v16, %v2257_v30 }
 0x196   :  { %v4632_v47 = vpop.f32.mrb[81].mxu0 }
 0x197   :  { %v4633_v49 = vadd.f32 %v4632_v47, %v4631_v44  ;;  %v4634_v38 = vpop.f32.mrb[82].mxu0  ;;  %v4695_v55 = vpop.f32.mrb[80].mxu1 }
 0x198   :  { %v4635_v51 = vpop.f32.mrb[83].mxu0  ;;  %v4696_v53 = vpop.f32.mrb[81].mxu1 }
 0x199   :  { %v2262_v46 = vadd.f32 %v4633_v49, %v6444_v5  ;;  %v4636_v52 = vadd.f32 %v4635_v51, %v4634_v38  ;;  %v4697_v0 = vadd.f32 %v4696_v53, %v4695_v55  ;;  %v4698_v43 = vpop.f32.mrb[82].mxu1 }
 0x19a   :  { %v4699_v54 = vpop.f32.mrb[83].mxu1 }
 0x19b   :  { %v2265_v48 = vadd.f32 %v4636_v52, %v6446_v6  ;;  %v6522_v57 = vadd.f32 %v4697_v0, %v2262_v46  ;;  %v4700_v58 = vadd.f32 %v4699_v54, %v4698_v43 }
 0x19d   :  { %v4637_v59 = vpop.f32.mrb[84].mxu0  ;;  %v6524_v62 = vadd.f32 %v4700_v58, %v2265_v48 }
 0x19e   :  { %v4638_v1 = vpop.f32.mrb[85].mxu0 }
 0x19f   :  { %v4639_v10 = vadd.f32 %v4638_v1, %v4637_v59  ;;  %v4640_v23 = vpop.f32.mrb[86].mxu0  ;;  %v4701_v63 = vpop.f32.mrb[84].mxu1 }
 0x1a0   :  { %v4641_v17 = vpop.f32.mrb[87].mxu0  ;;  %v4702_v61 = vpop.f32.mrb[85].mxu1 }
 0x1a1   :  { %v2270_v5 = vadd.f32 %v4639_v10, %v6462_v39  ;;  %v4642_v7 = vadd.f32 %v4641_v17, %v4640_v23  ;;  %v4703_v8 = vadd.f32 %v4702_v61, %v4701_v63  ;;  %v4704_v9 = vpop.f32.mrb[86].mxu1 }
 0x1a2   :  { %v4705_v12 = vpop.f32.mrb[87].mxu1 }
 0x1a3   :  { %v2273_v6 = vadd.f32 %v4642_v7, %v6464_v32  ;;  %v6528_v27 = vadd.f32 %v4703_v8, %v2270_v5  ;;  %v4706_v2 = vadd.f32 %v4705_v12, %v4704_v9 }
 0x1a5   :  { %v4643_v13 = vpop.f32.mrb[88].mxu0  ;;  %v6530_v18 = vadd.f32 %v4706_v2, %v2273_v6 }
 0x1a6   :  { %v4644_v21 = vpop.f32.mrb[89].mxu0 }
 0x1a7   :  { %v4645_v28 = vadd.f32 %v4644_v21, %v4643_v13  ;;  %v4646_v22 = vpop.f32.mrb[90].mxu0  ;;  %v4707_v29 = vpop.f32.mrb[88].mxu1 }
 0x1a8   :  { %v4647_v31 = vpop.f32.mrb[91].mxu0  ;;  %v4708_v25 = vpop.f32.mrb[89].mxu1 }
 0x1a9   :  { %v2278_v39 = vadd.f32 %v4645_v28, %v6474_v56  ;;  %v4648_v42 = vadd.f32 %v4647_v31, %v4646_v22  ;;  %v4709_v33 = vadd.f32 %v4708_v25, %v4707_v29  ;;  %v4710_v34 = vpop.f32.mrb[90].mxu1 }
 0x1aa   :  { %v4711_v35 = vpop.f32.mrb[91].mxu1 }
 0x1ab   :  { %v2281_v32 = vadd.f32 %v4648_v42, %v6476_v3  ;;  %v6534_v36 = vadd.f32 %v4709_v33, %v2278_v39  ;;  %v4712_v30 = vadd.f32 %v4711_v35, %v4710_v34 }
 0x1ad   :  { %v4649_v37 = vpop.f32.mrb[92].mxu0  ;;  %v6536_v16 = vadd.f32 %v4712_v30, %v2281_v32 }
 0x1ae   :  { %v4650_v44 = vpop.f32.mrb[93].mxu0 }
 0x1af   :  { %v4651_v47 = vadd.f32 %v4650_v44, %v4649_v37  ;;  %v4652_v49 = vpop.f32.mrb[94].mxu0  ;;  %v4713_v38 = vpop.f32.mrb[92].mxu1 }
 0x1b0   :  { %v4653_v55 = vpop.f32.mrb[95].mxu0  ;;  %v4714_v46 = vpop.f32.mrb[93].mxu1 }
 0x1b1   :  { %v2286_v56 = vadd.f32 %v4651_v47, %v6480_v11  ;;  %v4654_v51 = vadd.f32 %v4653_v55, %v4652_v49  ;;  %v4715_v52 = vadd.f32 %v4714_v46, %v4713_v38  ;;  %v4716_v53 = vpop.f32.mrb[94].mxu1 }
 0x1b2   :  { %v4717_v0 = vpop.f32.mrb[95].mxu1 }
 0x1b3   :  { %v2289_v3 = vadd.f32 %v4654_v51, %v6488_v19  ;;  %v6540_v43 = vadd.f32 %v4715_v52, %v2286_v56  ;;  %v4718_v48 = vadd.f32 %v4717_v0, %v4716_v53 }
 0x1b5   :  { %v4735_v54 = vpop.f32.mrb[96].mxu0  ;;  %v6542_v58 = vadd.f32 %v4718_v48, %v2289_v3 }
 0x1b6   :  { %v4736_v59 = vpop.f32.mrb[97].mxu0 }
 0x1b7   :  { %v4737_v1 = vadd.f32 %v4736_v59, %v4735_v54  ;;  %v4738_v10 = vpop.f32.mrb[98].mxu0  ;;  %v2520_v23 = vpop.f32.mrb[96].mxu1 }
 0x1b8   :  { %v4739_v63 = vpop.f32.mrb[99].mxu0  ;;  %v2522_v5 = vpop.f32.mrb[97].mxu1 }
 0x1b9   :  { %v2424_v11 = vadd.f32 %v4737_v1, %v6498_v41  ;;  %v4740_v17 = vadd.f32 %v4739_v63, %v4738_v10  ;;  %v2523_v7 = vpop.f32.mrb[98].mxu1 }
 0x1ba   :  { %v2525_v8 = vpop.f32.mrb[99].mxu1 }
 0x1bb   :  { %v2521_v61 = vadd.f32 %v2520_v23, %v2424_v11  ;;  %v2427_v19 = vadd.f32 %v4740_v17, %v6500_v50 }
 0x1bd   :  { %v2524_v9 = vadd.f32 %v2523_v7, %v2427_v19  ;;  %v4741_v6 = vpop.f32.mrb[100].mxu0  ;;  %5429 = vtanh.f32 %v2521_v61 }
 0x1be   :  { %v4742_v12 = vpop.f32.mrb[101].mxu0 }
 0x1bf   :  { %v4743_v2 = vadd.f32 %v4742_v12, %v4741_v6  ;;  %v4744_v13 = vpop.f32.mrb[102].mxu0  ;;  %v2528_v21 = vpop.f32.mrb[100].mxu1 }
 0x1c0   :  { %v4745_v28 = vpop.f32.mrb[103].mxu0  ;;  %v2530_v31 = vpop.f32.mrb[101].mxu1 }
 0x1c1   :  { %v2432_v22 = vadd.f32 %v4743_v2, %v6504_v60  ;;  %v4746_v29 = vadd.f32 %v4745_v28, %v4744_v13  ;;  %v2531_v39 = vpop.f32.mrb[102].mxu1 }
 0x1c2   :  { %v2533_v25 = vpop.f32.mrb[103].mxu1 }
 0x1c3   :  { %v2529_v41 = vadd.f32 %v2528_v21, %v2432_v22  ;;  %v2435_v42 = vadd.f32 %v4746_v29, %v6506_v4 }
 0x1c5   :  { %v2532_v33 = vadd.f32 %v2531_v39, %v2435_v42  ;;  %v4747_v34 = vpop.f32.mrb[104].mxu0 }
 0x1c6   :  { %v4748_v50 = vpop.f32.mrb[105].mxu0 }
 0x1c7   :  { %v4749_v32 = vadd.f32 %v4748_v50, %v4747_v34  ;;  %v4750_v35 = vpop.f32.mrb[106].mxu0  ;;  %v2536_v30 = vpop.f32.mrb[104].mxu1 }
 0x1c8   :  { %v4751_v37 = vpop.f32.mrb[107].mxu0  ;;  %v2538_v49 = vpop.f32.mrb[105].mxu1 }
 0x1c9   :  { %v2440_v44 = vadd.f32 %v4749_v32, %v6510_v14  ;;  %v4752_v47 = vadd.f32 %v4751_v37, %v4750_v35  ;;  %v2539_v38 = vpop.f32.mrb[106].mxu1  ;;  %v6552_v11 = vpop.eup %5429 }
 0x1ca   :  { %v2541_v56 = vpop.f32.mrb[107].mxu1 }
 0x1cb   :  { %v2537_v60 = vadd.f32 %v2536_v30, %v2440_v44  ;;  %v2443_v55 = vadd.f32 %v4752_v47, %v6512_v24 }
 0x1cd   :  { %5431 = vtanh.f32 %v2537_v60  ;;  %v2540_v4 = vadd.f32 %v2539_v38, %v2443_v55  ;;  %v4753_v51 = vpop.f32.mrb[108].mxu0 }
 0x1ce   :  { %5433 = vtanh.f32 %v2524_v9  ;;  %v4754_v46 = vpop.f32.mrb[109].mxu0 }
 0x1cf   :  { %5435 = vtanh.f32 %v2540_v4  ;;  %v4755_v52 = vadd.f32 %v4754_v46, %v4753_v51  ;;  %v4756_v53 = vpop.f32.mrb[110].mxu0  ;;  %v2544_v3 = vpop.f32.mrb[108].mxu1 }
 0x1d0   :  { %v4757_v0 = vpop.f32.mrb[111].mxu0  ;;  %v2546_v54 = vpop.f32.mrb[109].mxu1  ;;  %5437 = vtanh.f32 %v2529_v41 }
 0x1d1   :  { %v2448_v14 = vadd.f32 %v4755_v52, %v6516_v40  ;;  %v4758_v48 = vadd.f32 %v4757_v0, %v4756_v53  ;;  %v2547_v59 = vpop.f32.mrb[110].mxu1 }
 0x1d2   :  { %v2549_v10 = vpop.f32.mrb[111].mxu1 }
 0x1d3   :  { %v2545_v1 = vadd.f32 %v2544_v3, %v2448_v14  ;;  %v2451_v24 = vadd.f32 %v4758_v48, %v6518_v45 }
 0x1d5   :  { %5439 = vtanh.f32 %v2545_v1  ;;  %v2548_v23 = vadd.f32 %v2547_v59, %v2451_v24  ;;  %v4759_v63 = vpop.f32.mrb[112].mxu0 }
 0x1d6   :  { %5441 = vtanh.f32 %v2532_v33  ;;  %v4760_v17 = vpop.f32.mrb[113].mxu0 }
 0x1d7   :  { %v6554_v5 = vpop.eup %5431  ;;  %5443 = vtanh.f32 %v2548_v23  ;;  %v4761_v7 = vadd.f32 %v4760_v17, %v4759_v63  ;;  %v4762_v40 = vpop.f32.mrb[114].mxu0 }
 0x1d8   :  { %v6556_v61 = vpop.eup %5433  ;;  %v2552_v19 = vpop.f32.mrb[112].mxu1  ;;  %v2599_v45 = vmax.f32 %v6552_v11, %v6554_v5  ;;  %v2742_v11 = vld [vmem:[%s7119_s6 + $0x8] sm:$0xff]  ;;  %v2747_v5 = vld [vmem:[%s7119_s6 + $0x30] sm:$0xff] }
 0x1d9   :  { %v4763_v8 = vpop.f32.mrb[115].mxu0  ;;  %v6560_v9 = vpop.eup %5435  ;;  %v2456_v6 = vadd.f32 %v4761_v7, %v6522_v57 }
 0x1da   :  { %v4764_v12 = vadd.f32 %v4763_v8, %v4762_v40  ;;  %v2554_v2 = vpop.f32.mrb[113].mxu1  ;;  %v2600_v13 = vmax.f32 %v6556_v61, %v6560_v9  ;;  %v6566_v41 = vpop.eup %5437  ;;  %v2744_v61 = vld [vmem:[%s7119_s6 + $0x18] sm:$0xff]  ;;  %v2749_v9 = vld [vmem:[%s7119_s6 + $0x40] sm:$0xff] }
 0x1db   :  { %v2555_v21 = vpop.f32.mrb[114].mxu1  ;;  %v2553_v28 = vadd.f32 %v2552_v19, %v2456_v6 }
 0x1dc   :  { %v2459_v22 = vadd.f32 %v4764_v12, %v6524_v62  ;;  %v2557_v29 = vpop.f32.mrb[115].mxu1 }
 0x1dd   :  { %v4765_v39 = vpop.f32.mrb[116].mxu0  ;;  %5445 = vtanh.f32 %v2553_v28 }
 0x1de   :  { %v2556_v31 = vadd.f32 %v2555_v21, %v2459_v22  ;;  %v4766_v42 = vpop.f32.mrb[117].mxu0 }
 0x1df   :  { %v6568_v25 = vpop.eup %5439  ;;  %v4767_v33 = vadd.f32 %v4766_v42, %v4765_v39  ;;  %v4768_v34 = vpop.f32.mrb[118].mxu0 }
 0x1e0   :  { %v6570_v57 = vpop.eup %5441  ;;  %v2560_v50 = vpop.f32.mrb[116].mxu1  ;;  %v2601_v35 = vmax.f32 %v6566_v41, %v6568_v25  ;;  %v2746_v41 = vld [vmem:[%s7119_s6 + $0x28] sm:$0xff]  ;;  %v5126_v25 = vpack.c.bf16 %v2749_v9, %v2744_v61 }
 0x1e1   :  { %v4769_v32 = vpop.f32.mrb[119].mxu0  ;;  %v6574_v30 = vpop.eup %5443  ;;  %v2464_v62 = vadd.f32 %v4767_v33, %v6528_v27 }
 0x1e2   :  { %v4770_v37 = vadd.f32 %v4769_v32, %v4768_v34  ;;  %v2562_v44 = vpop.f32.mrb[117].mxu1  ;;  %v2602_v47 = vmax.f32 %v6570_v57, %v6574_v30  ;;  %5127 = vmatprep.subr.bf16.mxu0 %v5126_v25 }
 0x1e3   :  { %v2563_v49 = vpop.f32.mrb[118].mxu1  ;;  %v2561_v38 = vadd.f32 %v2560_v50, %v2464_v62  ;;  %v2748_v44 = vld [vmem:[%s7119_s6 + $0x38] sm:$0xff] }
 0x1e4   :  { %v2467_v60 = vadd.f32 %v4770_v37, %v6530_v18  ;;  %v2565_v55 = vpop.f32.mrb[119].mxu1  ;;  %v2743_v37 = vld [vmem:[%s7119_s6 + $0x10] sm:$0xff] }
 0x1e5   :  { %v4771_v4 = vpop.f32.mrb[120].mxu0 }
 0x1e6   :  { %v2564_v56 = vadd.f32 %v2563_v49, %v2467_v60  ;;  %v4772_v51 = vpop.f32.mrb[121].mxu0  ;;  %v5507_v49 = vmov 0.0   ;;  %v2750_v60 = vld [vmem:[%s7119_s6 + $0x48] sm:$0xff] }
 0x1e7   :  { %v4773_v46 = vadd.f32 %v4772_v51, %v4771_v4  ;;  %v4774_v52 = vpop.f32.mrb[122].mxu0  ;;  %v2568_v53 = vpop.f32.mrb[120].mxu1 }
 0x1e8   :  { %v4775_v3 = vpop.f32.mrb[123].mxu0  ;;  %v2570_v14 = vpop.f32.mrb[121].mxu1 }
 0x1e9   :  { %v2472_v0 = vadd.f32 %v4773_v46, %v6534_v36  ;;  %v4776_v27 = vadd.f32 %v4775_v3, %v4774_v52  ;;  %v2571_v48 = vpop.f32.mrb[122].mxu1  ;;  %v5446_v21 = vpop.eup %5445 }
 0x1ea   :  { %v2573_v1 = vpop.f32.mrb[123].mxu1 }
 0x1eb   :  { %v2569_v54 = vadd.f32 %v2568_v53, %v2472_v0  ;;  %v2475_v59 = vadd.f32 %v4776_v27, %v6536_v16 }
 0x1ed   :  { %5447 = vtanh.f32 %v2569_v54  ;;  %v2572_v18 = vadd.f32 %v2571_v48, %v2475_v59  ;;  %v4777_v24 = vpop.f32.mrb[124].mxu0 }
 0x1ee   :  { %5449 = vtanh.f32 %v2556_v31  ;;  %v4778_v10 = vpop.f32.mrb[125].mxu0 }
 0x1ef   :  { %5451 = vtanh.f32 %v2572_v18  ;;  %v4779_v23 = vadd.f32 %v4778_v10, %v4777_v24  ;;  %v4780_v63 = vpop.f32.mrb[126].mxu0  ;;  %v2576_v17 = vpop.f32.mrb[124].mxu1 }
 0x1f0   :  { %v4781_v7 = vpop.f32.mrb[127].mxu0  ;;  %v2578_v19 = vpop.f32.mrb[125].mxu1  ;;  %5453 = vtanh.f32 %v2561_v38  ;;  %v2745_v38 = vld [vmem:[%s7119_s6 + $0x20] sm:$0xff] }
 0x1f1   :  { %v2480_v36 = vadd.f32 %v4779_v23, %v6540_v43  ;;  %v4782_v40 = vadd.f32 %v4781_v7, %v4780_v63  ;;  %v2579_v8 = vpop.f32.mrb[126].mxu1  ;;  %v5130_v55 = vpack.c.bf16 %v2750_v60, %v2745_v38  ;;  %v3054_v38 = vsub.s32 4, %v6281_v20 }
 0x1f2   :  { %v2581_v12 = vpop.f32.mrb[127].mxu1 }
 0x1f3   :  { %v2577_v6 = vadd.f32 %v2576_v17, %v2480_v36  ;;  %v2483_v16 = vadd.f32 %v4782_v40, %v6542_v58 }
 0x1f5   :  { %5455 = vtanh.f32 %v2577_v6  ;;  %v2580_v2 = vadd.f32 %v2579_v8, %v2483_v16 }
 0x1f6   :  { %5457 = vtanh.f32 %v2564_v56  ;;  %v4293_v56 = vld [vmem:[%s7118_s5 + $0x80] ss:$0 sm:$0xff] }
 0x1f7   :  { %v5448_v28 = vpop.eup %5447  ;;  %5459 = vtanh.f32 %v2580_v2 }
 0x1f8   :  { %v5450_v22 = vpop.eup %5449  ;;  %v2603_v29 = vmax.f32 %v5446_v21, %v5448_v28  ;;  %v3028_v21 = vadd.s32 8, %v6281_v20  ;;  %v6650_v28 = vsub.s32 1, %v6281_v20 }
 0x1f9   :  { %v5452_v31 = vpop.eup %5451 }
 0x1fa   :  { %v2604_v39 = vmax.f32 %v5450_v22, %v5452_v31  ;;  %v2607_v43 = vmax.f32 %v2599_v45, %v2603_v29  ;;  %v5454_v42 = vpop.eup %5453  ;;  %v5122_v45 = vpack.c.bf16 %v2747_v5, %v2742_v11  ;;  %v3035_v22 = vld [vmem:[%s7120_s7] sm:$0x1f]  ;;  %v3050_v29 = vsub.s32 3, %v6281_v20  ;;  %v3318_v5 = vld [vmem:[%s7122_s9 + $0x28] sm:$0xff] }
 0x1fb   :  { %v3046_v31 = vsub.s32 2, %v6281_v20 }
 0x1fc   :  { %4963 = vmatprep.mubr.f32.mxu0 %v2607_v43  ;;  %v2608_v58 = vmax.f32 %v2600_v13, %v2604_v39  ;;  %v2741_v13 = vld [vmem:[%s7119_s6] sm:$0xff]  ;;  %5123 = vmatprep.subr.bf16.mxu1 %v5122_v45  ;;  %v6658_v39 = vand.u32 15, %v6281_v20  ;;  %v6660_v43 = vand.u32 15, %v3028_v21  ;;  %v3314_v21 = vld [vmem:[%s7122_s9 + $0x8] sm:$0xff] }
 0x1fe   :  { %4964 = vmatmul.mubr.f32.vlgmr.msra.gmra.mrb[128].mxu0 %v2608_v58  ;;  %v3043_v58 = vrot.slane %v3035_v22, %v6650_v28 }
 0x1ff   :  { %v5456_v33 = vpop.eup %5455  ;;  %2916 = vmatprep.mubr.f32.mxu0 %v5507_v49 }
 0x200   :  { %v5458_v34 = vpop.eup %5457  ;;  %v2605_v57 = vmax.f32 %v5454_v42, %v5456_v33  ;;  %v3051_v42 = vrot.slane %v3035_v22, %v3050_v29  ;;  %v3039_v33 = vrot.slane %v3035_v22, %v6291_v26  ;;  %vm3057_vm1 = vcmp.eq.s32.totalorder %v6658_v39, %v3043_v58  ;;  %v3332_v29 = vld [vmem:[%s7122_s9 + $0x98] sm:$0xff] }
 0x201   :  { %v5460_v50 = vpop.eup %5459  ;;  %vm3062_vm2 = vcmp.eq.s32.totalorder %v6660_v43, %v3043_v58 }
 0x202   :  { %v2606_v32 = vmax.f32 %v5458_v34, %v5460_v50  ;;  %v2609_v30 = vmax.f32 %v2601_v35, %v2605_v57  ;;  %v5124_v35 = vpack.c.bf16 %v2746_v41, %v2741_v13  ;;  %v3047_v34 = vrot.slane %v3035_v22, %v3046_v31  ;;  %vm6674_vm7 = vmpackc.low %vm3062_vm2, %vm3057_vm1 }
 0x203   :  { %vm3059_vm3 = vcmp.eq.s32.totalorder %v6658_v39, %v3051_v42  ;;  %vm3064_vm4 = vcmp.eq.s32.totalorder %v6660_v43, %v3051_v42  ;;  %vm3056_vm5 = vcmp.eq.s32.totalorder %v6658_v39, %v3039_v33  ;;  %vm3061_vm6 = vcmp.eq.s32.totalorder %v6660_v43, %v3039_v33 }
 0x204   :  { %4966 = vmatprep.mubr.f32.mxu1 %v2609_v30  ;;  %v2610_v62 = vmax.f32 %v2602_v47, %v2606_v32  ;;  %v5128_v47 = vpack.c.bf16 %v2748_v44, %v2743_v37  ;;  %v3029_v32 = vadd.s32 16, %v6281_v20  ;;  %v3030_v30 = vadd.s32 24, %v6281_v20  ;;  %vm5147_vm10 = vmpackc.low %vm3064_vm4, %vm3059_vm3 }
 0x205   :  { %vm3058_vm8 = vcmp.eq.s32.totalorder %v6658_v39, %v3047_v34  ;;  %vm3063_vm9 = vcmp.eq.s32.totalorder %v6660_v43, %v3047_v34  ;;  %vm5138_vm11 = vmpackc.low %vm3061_vm6, %vm3056_vm5 }
 0x206   :  { %4967 = vmatmul.mubr.f32.vlgmr.msra.gmra.mrb[128].mxu1 %v2610_v62  ;;  %5129 = vmatpush1.bf16.msra.mxu0 %v5128_v47  ;;  %v6680_v9 = vand.u32 15, %v3029_v32  ;;  %v6682_v13 = vand.u32 15, %v3030_v30  ;;  %vm5150_vm12 = vmpackc.low %vm3063_vm9, %vm3058_vm8  ;;  %v3334_v32 = vld [vmem:[%s7122_s9 + $0xa8] sm:$0xff] }
 0x207   :  { %5125 = vmatpush1.bf16.msra.mxu1 %v5124_v35  ;;  %2827 = vmatprep.mubr.f32.mxu1 %v5507_v49 }
 0x208   :  { %5131 = vmatprep.subr.bf16.mxu1 %v5130_v55  ;;  %vm3067_vm13 = vcmp.eq.s32.totalorder %v6680_v9, %v3043_v58  ;;  %vm3072_vm14 = vcmp.eq.s32.totalorder %v6682_v13, %v3043_v58  ;;  %vm3069_vm15 = vcmp.eq.s32.totalorder %v6680_v9, %v3051_v42  ;;  %vm3066_vm1 = vcmp.eq.s32.totalorder %v6680_v9, %v3039_v33  ;;  %v3393_v58 = vld [vmem:[%s7114_s1] sm:$0x3] }
 0x209   :  { %vm3071_vm2 = vcmp.eq.s32.totalorder %v6682_v13, %v3039_v33  ;;  %vm6693_vm3 = vmpackc.low %vm3072_vm14, %vm3067_vm13  ;;  %vm3068_vm4 = vcmp.eq.s32.totalorder %v6680_v9, %v3047_v34  ;;  %vm3073_vm5 = vcmp.eq.s32.totalorder %v6682_v13, %v3047_v34  ;;  %v3315_v34 = vld [vmem:[%s7122_s9 + $0x10] sm:$0xff] }
 0x20a   :  { %vm5156_vm8 = vmpackc.low %vm3073_vm5, %vm3068_vm4 }
 0x2d1   :  { %v4965_v4 = vpop.f32.mrb[128].mxu0 }
 0x2d2   :  { %v2704_v51 = vadd.f32 %v4965_v4, %v4293_v56  ;;  %v2698_v46 = vpop.f32.mrb[129].mxu0 }
 0x2d3   :  { %v2699_v52 = vadd.f32 %v4293_v56, %v2698_v46  ;;  %v3055_v46 = vrot.slane %v3035_v22, %v3054_v38  ;;  %v3331_v22 = vld [vmem:[%s7122_s9 + $0x90] sm:$0xff]  ;;  %v3321_v38 = vld [vmem:[%s7122_s9 + $0x40] sm:$0xff] }
 0x2d4   :  { %v2718_v53 = vsub.f32 0.0, %v2704_v51  ;;  %v5182_v33 = vpack.c.bf16 %v3332_v29, %v3331_v22  ;;  %v3378_v22 = vld [vmem:[%s7122_s9 + $0x208] sm:$0xff] }
 0x2d5   :  { %v2717_v3 = vsub.f32 0.0, %v2699_v52  ;;  %vm3060_vm9 = vcmp.eq.s32.totalorder %v6658_v39, %v3055_v46  ;;  %vm3070_vm13 = vcmp.eq.s32.totalorder %v6680_v9, %v3055_v46  ;;  %vm3075_vm14 = vcmp.eq.s32.totalorder %v6682_v13, %v3055_v46  ;;  %v3398_v39 = vld [vmem:[%s7123_s10 + $0x20] sm:$0xff] }
 0x2d6   :  { %v2723_v0 = vmul.f32 1.442695, %v2718_v53 }
 0x2d7   :  { %v2721_v27 = vmul.f32 1.442695, %v2717_v3 }
 0x2d8   :  { %5461 = vpow2.f32 %v2723_v0 }
 0x2d9   :  { %5463 = vpow2.f32 %v2721_v27  ;;  %v4968_v14 = vpop.f32.mrb[128].mxu1 }
 0x2da   :  { %v2714_v48 = vadd.f32 %v4968_v14, %v4293_v56  ;;  %v2708_v54 = vpop.f32.mrb[129].mxu1 }
 0x2db   :  { %v2709_v59 = vadd.f32 %v4293_v56, %v2708_v54 }
 0x2dc   :  { %v2720_v1 = vsub.f32 0.0, %v2714_v48 }
 0x2dd   :  { %v2719_v18 = vsub.f32 0.0, %v2709_v59  ;;  %v3394_v59 = vld [vmem:[%s7123_s10] sm:$0xff] }
 0x2de   :  { %v2727_v24 = vmul.f32 1.442695, %v2720_v1  ;;  %v3395_v1 = vld [vmem:[%s7123_s10 + $0x8] sm:$0xff] }
 0x2df   :  { %v2725_v10 = vmul.f32 1.442695, %v2719_v18 }
 0x2e0   :  { %5465 = vpow2.f32 %v2727_v24 }
 0x2e1   :  { %5467 = vpow2.f32 %v2725_v10  ;;  %v3096_v10 = vld [vmem:[%s7121_s8] sm:$0x3] }
 0x2e2   :  { %v5462_v23 = vpop.eup %5461 }
 0x2e3   :  { %v5464_v63 = vpop.eup %5463  ;;  %v2730_v7 = vadd.f32 1.0, %v5462_v23  ;;  %v5167_v23 = vpack.c.bf16 %v3395_v1, %v3394_v59  ;;  %v3326_v59 = vld [vmem:[%s7122_s9 + $0x68] sm:$0xff] }
 0x2e4   :  { %v2729_v17 = vadd.f32 1.0, %v5464_v63 }
 0x2e6   :  { %5469 = vrcp.f32 %v2729_v17  ;;  %v5508_v17 = vmov 0.0|0.0  }
 0x2e7   :  { %5471 = vrcp.f32 %v2730_v7  ;;  %v3396_v7 = vld [vmem:[%s7123_s10 + $0x10] sm:$0xff] }
 0x2ea   :  { %v5466_v36 = vpop.eup %5465 }
 0x2eb   :  { %v5468_v40 = vpop.eup %5467  ;;  %v2732_v8 = vadd.f32 1.0, %v5466_v36  ;;  %v3397_v36 = vld [vmem:[%s7123_s10 + $0x18] sm:$0xff] }
 0x2ec   :  { %v2731_v19 = vadd.f32 1.0, %v5468_v40 }
 0x2ee   :  { %5473 = vrcp.f32 %v2731_v19 }
 0x2ef   :  { %5475 = vrcp.f32 %v2732_v8  ;;  %v5170_v8 = vpack.c.bf16 %v3397_v36, %v3396_v7  ;;  %v3481_v7 = vld [vmem:[%s7123_s10 + $0x40] sm:$0xff]  ;;  %v3327_v36 = vld [vmem:[%s7122_s9 + $0x70] sm:$0xff] }
 0x2f0   :  { %v5470_v6 = vpop.eup %5469 }
 0x2f1   :  { %4294 = vmatmul.mubr.msk.f32.vlgmr.msra.gmra.mrb[130].mxu1 %vm1782_vm0, %v5470_v6  ;;  %4298 = vmatmul.mubr.msk.f32.vlgmr.msra.gmra.mrb[130].mxu0 %vm1782_vm0, %v5470_v6  ;;  %v5472_v16 = vpop.eup %5471 }
 0x2f2   :  { %2833 = vmatprep.mubr.f32.mxu1 %v5507_v49  ;;  %2922 = vmatprep.mubr.f32.mxu0 %v5507_v49 }
 0x2f3   :  { %5133 = vmatpush3.bf16.msra.mxu1 %v5130_v55 }
 0x2f5   :  { %4295 = vmatmul.mubr.msk.f32.gmra.mrb[132].mxu1 %vm1782_vm0, %v5472_v16  ;;  %4299 = vmatmul.mubr.msk.f32.gmra.mrb[132].mxu0 %vm1782_vm0, %v5472_v16 }
 0x2f6   :  { %2839 = vmatprep.mubr.f32.mxu1 %v5507_v49  ;;  %2928 = vmatprep.mubr.f32.mxu0 %v5507_v49 }
 0x2f8   :  { %v5474_v12 = vpop.eup %5473 }
 0x2f9   :  { %4296 = vmatmul.mubr.msk.f32.gmra.mrb[134].mxu1 %vm1782_vm0, %v5474_v12  ;;  %4300 = vmatmul.mubr.msk.f32.gmra.mrb[134].mxu0 %vm1782_vm0, %v5474_v12  ;;  %v5476_v2 = vpop.eup %5475 }
 0x2fa   :  { %2845 = vmatprep.mubr.f32.mxu1 %v5507_v49  ;;  %2934 = vmatprep.mubr.f32.mxu0 %v5507_v49 }
 0x2fd   :  { %4297 = vmatmul.mubr.msk.f32.gmra.mrb[136].mxu1 %vm1782_vm0, %v5476_v2  ;;  %4301 = vmatmul.mubr.msk.f32.gmra.mrb[136].mxu0 %vm1782_vm0, %v5476_v2 }
 0x2fe   :  { %4973 = vmatprep.mubr.msk.f32.mxu1 %vm1782_vm0, %v5470_v6  ;;  %3165 = vmatprep.mubr.f32.mxu0 %v5507_v49 }
 0x301   :  { %4974 = vmatmul.mubr.msk.f32.vlgmr.msra.gmra.mrb[138].mxu1 %vm1782_vm0, %v5472_v16  ;;  %v3329_v16 = vld [vmem:[%s7122_s9 + $0x80] sm:$0xff] }
 0x302   :  { %4976 = vmatprep.mubr.msk.f32.mxu1 %vm1782_vm0, %v5474_v12  ;;  %v3330_v12 = vld [vmem:[%s7122_s9 + $0x88] sm:$0xff] }
 0x305   :  { %4977 = vmatmul.mubr.msk.f32.gmra.mrb[140].mxu1 %vm1782_vm0, %v5476_v2  ;;  %vm3074_vm0 = vcmp.eq.s32.totalorder %v6682_v13, %v3051_v42  ;;  %v3313_v2 = vld [vmem:[%s7122_s9] sm:$0xff] }
 0x306   :  { %3236 = vmatprep.mubr.f32.mxu1 %v5507_v49  ;;  %vm5153_vm6 = vmpackc.low %vm3074_vm0, %vm3069_vm15  ;;  %vm5509_vm0 = vmmov 0   ;;  %v5180_v42 = vpack.c.bf16 %v3314_v21, %v3313_v2  ;;  %v3377_v21 = vld [vmem:[%s7122_s9 + $0x200] sm:$0xff] }
 0x307   :  { %vm5164_vm15 = vmpackc.low %vm3075_vm14, %vm3070_vm13 }
 0x3c4   :  { %v2829_v57 = vpop.f32.mrb[130].mxu1  ;;  %v2918_v50 = vpop.f32.mrb[130].mxu0 }
 0x3c5   :  { %v2831_v62 = vpop.f32.mrb[131].mxu1  ;;  %v2920_v11 = vpop.f32.mrb[131].mxu0 }
 0x3c8   :  { %v2835_v61 = vpop.f32.mrb[132].mxu1  ;;  %v2924_v45 = vpop.f32.mrb[132].mxu0 }
 0x3c9   :  { %v5137_v41 = vpack.c.bf16 %v2835_v61, %v2829_v57  ;;  %v5149_v25 = vpack.c.bf16 %v2924_v45, %v2918_v50  ;;  %v2837_v35 = vpop.f32.mrb[133].mxu1  ;;  %v2926_v37 = vpop.f32.mrb[133].mxu0  ;;  %v3316_v57 = vld [vmem:[%s7122_s9 + $0x18] sm:$0xff]  ;;  %v3333_v50 = vld [vmem:[%s7122_s9 + $0xa0] sm:$0xff]  ;;  %v3335_v61 = vld [vmem:[%s7122_s9 + $0xb0] sm:$0xff] }
 0x3ca   :  { %v5134_v44 = vpack.c.bf16 %v2837_v35, %v2831_v62  ;;  %v5146_v47 = vpack.c.bf16 %v2926_v37, %v2920_v11  ;;  %v5184_v30 = vpack.c.bf16 %v3316_v57, %v3315_v34  ;;  %v5186_v62 = vpack.c.bf16 %v3334_v32, %v3333_v50  ;;  %v3317_v11 = vld [vmem:[%s7122_s9 + $0x20] sm:$0xff]  ;;  %v3336_v45 = vld [vmem:[%s7122_s9 + $0xb8] sm:$0xff]  ;;  %v3338_v37 = vld [vmem:[%s7122_s9 + $0xc8] sm:$0xff] }
 0x3cb   :  { %v5188_v9 = vpack.c.bf16 %v3318_v5, %v3317_v11  ;;  %v5190_v13 = vpack.c.bf16 %v3336_v45, %v3335_v61  ;;  %v3337_v35 = vld [vmem:[%s7122_s9 + $0xc0] sm:$0xff]  ;;  %v3380_v34 = vld [vmem:[%s7122_s9 + $0x218] sm:$0xff]  ;;  %v3346_v45 = vld [vmem:[%s7122_s9 + $0x108] sm:$0xff] }
 0x3cc   :  { %v2841_v60 = vpop.f32.mrb[134].mxu1  ;;  %v2930_v55 = vpop.f32.mrb[134].mxu0  ;;  %5136 = vmatprep.subr.msk.bf16.mxu0 %vm6674_vm7, %v5134_v44  ;;  %5148 = vmatprep.subr.msk.bf16.mxu1 %vm5147_vm10, %v5146_v47  ;;  %vm5144_vm7 = vmpackc.low %vm3071_vm2, %vm3066_vm1  ;;  %vm3065_vm10 = vcmp.eq.s32.totalorder %v6660_v43, %v3055_v46  ;;  %v5178_v43 = vpack.c.bf16 %v3330_v12, %v3329_v16  ;;  %vm3403_vm1 = vcmask 326656   ;;  %v5194_v47 = vpack.c.bf16 %v3338_v37, %v3337_v35  ;;  %v3323_v46 = vld [vmem:[%s7122_s9 + $0x50] sm:$0xff]  ;;  %v3362_v16 = vld [vmem:[%s7122_s9 + $0x188] sm:$0xff] }
 0x3cd   :  { %v2843_v56 = vpop.f32.mrb[135].mxu1  ;;  %v2932_v4 = vpop.f32.mrb[135].mxu0  ;;  %5139 = vmatpush1.bf16.msk.msra.mxu0 %vm5138_vm11, %v5137_v41  ;;  %5151 = vmatpush1.bf16.msk.msra.mxu1 %vm5150_vm12, %v5149_v25  ;;  %vm3097_vm11 = vcmask 261120   ;;  %vm5160_vm12 = vmpackc.low %vm3065_vm10, %vm3060_vm9  ;;  %v3319_v41 = vld [vmem:[%s7122_s9 + $0x30] sm:$0xff]  ;;  %v3320_v25 = vld [vmem:[%s7122_s9 + $0x38] sm:$0xff] }
 0x3ce   :  { %v5192_v44 = vpack.c.bf16 %v3320_v25, %v3319_v41  ;;  %v3482_v12 = vld [vmem:[%s7123_s10 + $0x48] sm:$0xff]  ;;  %v6881_v57 = vld [vmem:[%s7124_s11] sm:$0x7]  ;;  %v3364_v41 = vld [vmem:[%s7122_s9 + $0x198] sm:$0xff] }
 0x3cf   :  { %v3381_v32 = vld [vmem:[%s7122_s9 + $0x220] sm:$0xff]  ;;  %v3383_v25 = vld [vmem:[%s7122_s9 + $0x230] sm:$0xff]  ;;  %v3384_v35 = vld [vmem:[%s7122_s9 + $0x238] sm:$0xff] }
 0x3d0   :  { %v2847_v52 = vpop.f32.mrb[136].mxu1  ;;  %v2936_v53 = vpop.f32.mrb[136].mxu0  ;;  %v3345_v61 = vld [vmem:[%s7122_s9 + $0x100] sm:$0xff] }
 0x3d1   :  { %v5143_v3 = vpack.c.bf16 %v2847_v52, %v2841_v60  ;;  %v5155_v0 = vpack.c.bf16 %v2936_v53, %v2930_v55  ;;  %v2849_v27 = vpop.f32.mrb[137].mxu1  ;;  %v2938_v14 = vpop.f32.mrb[137].mxu0  ;;  %v3322_v60 = vld [vmem:[%s7122_s9 + $0x48] sm:$0xff]  ;;  %v3324_v52 = vld [vmem:[%s7122_s9 + $0x58] sm:$0xff] }
 0x3d2   :  { %v5140_v48 = vpack.c.bf16 %v2849_v27, %v2843_v56  ;;  %v5152_v54 = vpack.c.bf16 %v2938_v14, %v2932_v4  ;;  %v5196_v55 = vpack.c.bf16 %v3322_v60, %v3321_v38  ;;  %v3339_v56 = vld [vmem:[%s7122_s9 + $0xd0] sm:$0xff]  ;;  %v3340_v4 = vld [vmem:[%s7122_s9 + $0xd8] sm:$0xff]  ;;  %v5200_v53 = vpack.c.bf16 %v3324_v52, %v3323_v46  ;;  %v3478_v27 = vld [vmem:[%s7123_s10 + $0x28] sm:$0xff] }
 0x3d3   :  { %v5198_v51 = vpack.c.bf16 %v3340_v4, %v3339_v56  ;;  %v3348_v56 = vld [vmem:[%s7122_s9 + $0x118] sm:$0xff]  ;;  %v3365_v4 = vld [vmem:[%s7122_s9 + $0x1a0] sm:$0xff]  ;;  %v3366_v46 = vld [vmem:[%s7122_s9 + $0x1a8] sm:$0xff] }
 0x3d4   :  { %v4975_v18 = vpop.f32.mrb[138].mxu1  ;;  %5142 = vmatprep.subr.msk.bf16.mxu0 %vm6693_vm3, %v5140_v48  ;;  %5154 = vmatprep.subr.msk.bf16.mxu1 %vm5153_vm6, %v5152_v54  ;;  %v3479_v48 = vld [vmem:[%s7123_s10 + $0x30] sm:$0xff]  ;;  %v3325_v54 = vld [vmem:[%s7122_s9 + $0x60] sm:$0xff] }
 0x3d5   :  { %v3007_v24 = vpop.f32.mrb[139].mxu1  ;;  %5145 = vmatpush1.bf16.msk.msra.mxu0 %vm5144_vm7, %v5143_v3  ;;  %5157 = vmatpush1.bf16.msk.msra.mxu1 %vm5156_vm8, %v5155_v0  ;;  %v3341_v3 = vld [vmem:[%s7122_s9 + $0xe0] sm:$0xff]  ;;  %v3342_v0 = vld [vmem:[%s7122_s9 + $0xe8] sm:$0xff]  ;;  %v5173_v1 = vpack.c.bf16 %v3479_v48, %v3478_v27  ;;  %v3367_v48 = vld [vmem:[%s7122_s9 + $0x1b0] sm:$0xff] }
 0x3d6   :  { %v5159_v63 = vpack.c.bf16 %v4975_v18, %v3007_v24  ;;  %5158 = vmatprep.subr.bf16.mxu0 %v5508_v17  ;;  %5166 = vmatprep.subr.bf16.mxu1 %v5508_v17  ;;  %v5202_v14 = vpack.c.bf16 %v3342_v0, %v3341_v3  ;;  %v5204_v18 = vpack.c.bf16 %v3326_v59, %v3325_v54  ;;  %v3343_v24 = vld [vmem:[%s7122_s9 + $0xf0] sm:$0xff]  ;;  %v3385_v52 = vld [vmem:[%s7122_s9 + $0x240] sm:$0xff]  ;;  %v3368_v59 = vld [vmem:[%s7122_s9 + $0x1b8] sm:$0xff] }
 0x3d7   :  { %v5218_v0 = vpack.c.bf16 %v3366_v46, %v3365_v4  ;;  %v3349_v27 = vld [vmem:[%s7122_s9 + $0x120] sm:$0xff] }
 0x3d8   :  { %v4978_v40 = vpop.f32.mrb[140].mxu1  ;;  %4323 = vmatmul.mubr.msk.f32.vlgmr.msra.gmra.mrb[142].mxu1 %vm3097_vm11, %v3096_v10  ;;  %4314 = vmatmul.mubr.msk.f32.vlgmr.msra.gmra.mrb[138].mxu0 %vm3097_vm11, %v3096_v10 }
 0x3d9   :  { %v3017_v19 = vpop.f32.mrb[141].mxu1  ;;  %5161 = vmatpush3.bf16.msk.msra.mxu0 %vm5160_vm12, %v5159_v63  ;;  %5168 = vmatpush3.bf16.msra.mxu1 %v5167_v23  ;;  %v3480_v23 = vld [vmem:[%s7123_s10 + $0x38] sm:$0xff] }
 0x3da   :  { %v5163_v6 = vpack.c.bf16 %v4978_v40, %v3017_v19  ;;  %5162 = vmatprep.subr.bf16.mxu0 %v5508_v17  ;;  %5169 = vmatprep.subr.bf16.mxu1 %v5508_v17  ;;  %v3328_v40 = vld [vmem:[%s7122_s9 + $0x78] sm:$0xff]  ;;  %v5176_v19 = vpack.c.bf16 %v3481_v7, %v3480_v23  ;;  %v3351_v23 = vld [vmem:[%s7122_s9 + $0x130] sm:$0xff]  ;;  %v3369_v7 = vld [vmem:[%s7122_s9 + $0x1c0] sm:$0xff] }
 0x3db   :  { %5000 = vmatprep.mubr.msk.f32.mxu1 %vm5509_vm0, %v5507_v49  ;;  %4987 = vmatprep.mubr.msk.f32.mxu0 %vm5509_vm0, %v5507_v49 }
 0x3dd   :  { %5165 = vmatpush3.bf16.msk.msra.mxu0 %vm5164_vm15, %v5163_v6  ;;  %5171 = vmatpush3.bf16.msra.mxu1 %v5170_v8  ;;  %v5208_v8 = vpack.c.bf16 %v3328_v40, %v3327_v36  ;;  %v3361_v6 = vld [vmem:[%s7122_s9 + $0x180] sm:$0xff]  ;;  %v3370_v40 = vld [vmem:[%s7122_s9 + $0x1c8] sm:$0xff] }
 0x3de   :  { %4998 = vmatprep.subr.mxu1 %v5507_v49  ;;  %5172 = vmatprep.subr.bf16.mxu0 %v5508_v17  ;;  %v5210_v2 = vpack.c.bf16 %v3362_v16, %v3361_v6  ;;  %v5226_v16 = vpack.c.bf16 %v3370_v40, %v3369_v7  ;;  %v3859_v7 = vld [vmem:[%s7123_s10 + $0x80] sm:$0xff] }
 0x3e0   :  { %4988 = vmatmul.mubr.msk.f32.vlgmr.msra.gmra.mrb[140].mxu0 %vm3097_vm11, %v3096_v10  ;;  %v3344_v10 = vld [vmem:[%s7122_s9 + $0xf8] sm:$0xff] }
 0x3e1   :  { %4999 = vmatpush3.msra.mxu1 %v3398_v39  ;;  %5013 = vmatprep.mubr.msk.f32.mxu0 %vm5509_vm0, %v5507_v49  ;;  %v5206_v63 = vpack.c.bf16 %v3344_v10, %v3343_v24  ;;  %v5222_v10 = vpack.c.bf16 %v3368_v59, %v3367_v48 }
 0x3e2   :  { %5001 = vmatmul.mubr.msk.f32.vlgmr.msra.gmra.mrb[144].mxu1 %vm3403_vm1, %v3393_v58  ;;  %5179 = vmatprep.subr.bf16.mxu1 %v5178_v43  ;;  %v5243_v43 = vpack.c.bf16 %v3378_v22, %v3377_v21  ;;  %v3371_v21 = vld [vmem:[%s7122_s9 + $0x1d0] sm:$0xff] }
 0x3e3   :  { %5181 = vmatpush3.bf16.msra.mxu1 %v5180_v42  ;;  %5174 = vmatpush3.bf16.msra.mxu0 %v5173_v1  ;;  %v3387_v1 = vld [vmem:[%s7122_s9 + $0x250] sm:$0xff] }
 0x3e4   :  { %5183 = vmatprep.subr.bf16.mxu1 %v5182_v33  ;;  %5175 = vmatprep.subr.bf16.mxu0 %v5508_v17  ;;  %v3379_v33 = vld [vmem:[%s7122_s9 + $0x210] sm:$0xff] }
 0x3e5   :  { %v5246_v50 = vpack.c.bf16 %v3380_v34, %v3379_v33  ;;  %v3355_v34 = vld [vmem:[%s7122_s9 + $0x150] sm:$0xff] }
 0x3e7   :  { %5185 = vmatpush3.bf16.msra.mxu1 %v5184_v30  ;;  %5177 = vmatpush3.bf16.msra.mxu0 %v5176_v19  ;;  %v3382_v30 = vld [vmem:[%s7122_s9 + $0x228] sm:$0xff]  ;;  %v3389_v19 = vld [vmem:[%s7122_s9 + $0x260] sm:$0xff] }
 0x3e8   :  { %5187 = vmatprep.subr.bf16.mxu1 %v5186_v62  ;;  %5011 = vmatprep.subr.mxu0 %v5507_v49  ;;  %v3402_v62 = vrot.slane %v6881_v57, %v6291_v26  ;;  %v5249_v11 = vpack.c.bf16 %v3382_v30, %v3381_v32  ;;  %v3373_v30 = vld [vmem:[%s7122_s9 + $0x1e0] sm:$0xff] }
 0x3eb   :  { %5189 = vmatpush3.bf16.msra.mxu1 %v5188_v9  ;;  %5012 = vmatpush3.msra.mxu0 %v3482_v12  ;;  %v3363_v9 = vld [vmem:[%s7122_s9 + $0x190] sm:$0xff]  ;;  %v3353_v12 = vld [vmem:[%s7122_s9 + $0x140] sm:$0xff] }
 0x3ec   :  { %5191 = vmatprep.subr.bf16.mxu1 %v5190_v13  ;;  %5211 = vmatprep.subr.bf16.mxu0 %v5210_v2  ;;  %v5214_v60 = vpack.c.bf16 %v3364_v41, %v3363_v9  ;;  %v3354_v2 = vld [vmem:[%s7122_s9 + $0x148] sm:$0xff] }
 0x3ed   :  { %v3358_v9 = vld [vmem:[%s7122_s9 + $0x168] sm:$0xff] }
 0x3ef   :  { %5193 = vmatpush3.bf16.msra.mxu1 %v5192_v44 }
 0x3f0   :  { %5195 = vmatprep.subr.bf16.mxu1 %v5194_v47  ;;  %v5212_v47 = vpack.c.bf16 %v3346_v45, %v3345_v61  ;;  %v3357_v45 = vld [vmem:[%s7122_s9 + $0x160] sm:$0xff] }
 0x3f1   :  { %v5236_v41 = vpack.c.bf16 %v3358_v9, %v3357_v45 }
 0x3f3   :  { %5197 = vmatpush3.bf16.msra.mxu1 %v5196_v55  ;;  %v3347_v55 = vld [vmem:[%s7122_s9 + $0x110] sm:$0xff] }
 0x3f4   :  { %5199 = vmatprep.subr.bf16.mxu1 %v5198_v51  ;;  %v5252_v51 = vpack.c.bf16 %v3384_v35, %v3383_v25  ;;  %v5216_v3 = vpack.c.bf16 %v3348_v56, %v3347_v55  ;;  %v3359_v35 = vld [vmem:[%s7122_s9 + $0x170] sm:$0xff] }
 0x3f5   :  { %v3779_v56 = vld [vmem:[%s7123_s10 + $0x70] sm:$0xff] }
 0x3f7   :  { %5201 = vmatpush3.bf16.msra.mxu1 %v5200_v53  ;;  %v3386_v53 = vld [vmem:[%s7122_s9 + $0x248] sm:$0xff] }
 0x3f8   :  { %5203 = vmatprep.subr.bf16.mxu1 %v5202_v14  ;;  %v3350_v14 = vld [vmem:[%s7122_s9 + $0x128] sm:$0xff]  ;;  %v5255_v54 = vpack.c.bf16 %v3386_v53, %v3385_v52 }
 0x3f9   :  { %v5220_v24 = vpack.c.bf16 %v3350_v14, %v3349_v27 }
 0x3fb   :  { %5205 = vmatpush3.bf16.msra.mxu1 %v5204_v18  ;;  %v3388_v18 = vld [vmem:[%s7122_s9 + $0x258] sm:$0xff] }
 0x3fc   :  { %5207 = vmatprep.subr.bf16.mxu1 %v5206_v63  ;;  %v3352_v63 = vld [vmem:[%s7122_s9 + $0x138] sm:$0xff]  ;;  %v5258_v36 = vpack.c.bf16 %v3388_v18, %v3387_v1  ;;  %v3769_v1 = vrot.slane %v6881_v57, %v6650_v28 }
 0x3fd   :  { %v5224_v6 = vpack.c.bf16 %v3352_v63, %v3351_v23  ;;  %v3858_v63 = vld [vmem:[%s7123_s10 + $0x78] sm:$0xff] }
 0x3fe   :  { %v5273_v40 = vpack.c.bf16 %v3859_v7, %v3858_v63 }
 0x3ff   :  { %5209 = vmatpush3.bf16.msra.mxu1 %v5208_v8  ;;  %v3390_v8 = vld [vmem:[%s7122_s9 + $0x268] sm:$0xff] }
 0x400   :  { %5242 = vmatprep.subr.bf16.mxu1 %v5508_v17  ;;  %v5261_v22 = vpack.c.bf16 %v3390_v8, %v3389_v19  ;;  %v3860_v8 = vld [vmem:[%s7123_s10 + $0x88] sm:$0xff] }
 0x4ab   :  { %v6870_v29 = vpop.f32.mrb[142].mxu1  ;;  %v3167_v39 = vpop.f32.mrb[138].mxu0 }
 0x4ac   :  { %v3240_v58 = vpop.f32.mrb[143].mxu1  ;;  %v3169_v42 = vpop.f32.mrb[139].mxu0 }
 0x4ad   :  { %3620 = vmatprep.mubr.f32.mxu1 %v3169_v42  ;;  %v5228_v42 = vpack.c.bf16 %v3354_v2, %v3353_v12  ;;  %v3862_v12 = vld [vmem:[%s7123_s10 + $0x98] sm:$0xff]  ;;  %v3857_v2 = vld [vmem:[%s7115_s2] sm:$0x3] }
 0x4ae   :  { %3621 = vmatmul.mubr.f32.vlgmr.msra.gmra.mrb[146].mxu1 %v3167_v39  ;;  %v3372_v39 = vld [vmem:[%s7122_s9 + $0x1d8] sm:$0xff] }
 0x4af   :  { %5244 = vmatpush3.bf16.msra.mxu1 %v5243_v43  ;;  %5048 = vmatprep.mubr.msk.f32.mxu1 %vm5509_vm0, %v5507_v49  ;;  %v3391_v43 = vld [vmem:[%s7122_s9 + $0x270] sm:$0xff]  ;;  %v5230_v33 = vpack.c.bf16 %v3372_v39, %v3371_v21  ;;  %v43_v21 = vld [vmem:[%s7117_s4] sm:$0xff] }
 0x4b0   :  { %5245 = vmatprep.subr.bf16.mxu1 %v5508_v17 }
 0x4b3   :  { %5247 = vmatpush3.bf16.msra.mxu1 %v5246_v50  ;;  %v6894_v5 = vpop.f32.mrb[140].mxu0  ;;  %v3356_v50 = vld [vmem:[%s7122_s9 + $0x158] sm:$0xff] }
 0x4b4   :  { %5248 = vmatprep.subr.bf16.mxu1 %v5508_v17  ;;  %v4989_v13 = vpop.f32.mrb[141].mxu0 }
 0x4b5   :  { %v3473_v26 = vpop.f32.mrb[144].mxu1  ;;  %v3375_v13 = vld [vmem:[%s7122_s9 + $0x1f0] sm:$0xff] }
 0x4b6   :  { %v3474_v37 = vadd.f32 %v3473_v26, %v3402_v62  ;;  %v5002_v44 = vpop.f32.mrb[145].mxu1  ;;  %v3374_v62 = vld [vmem:[%s7122_s9 + $0x1e8] sm:$0xff]  ;;  %v3376_v26 = vld [vmem:[%s7122_s9 + $0x1f8] sm:$0xff] }
 0x4b7   :  { %5250 = vmatpush3.bf16.msra.mxu1 %v5249_v11  ;;  %v5232_v11 = vpack.c.bf16 %v3356_v50, %v3355_v34  ;;  %v5234_v61 = vpack.c.bf16 %v3374_v62, %v3373_v30  ;;  %v5238_v25 = vpack.c.bf16 %v3376_v26, %v3375_v13  ;;  %v3783_v34 = vrot.slane %v6881_v57, %v3046_v31 }
 0x4b8   :  { %v3477_v38 = vmax.f32 %v3474_v37, 0.0  ;;  %5251 = vmatprep.subr.bf16.mxu1 %v5508_v17  ;;  %v3360_v37 = vld [vmem:[%s7122_s9 + $0x178] sm:$0xff] }
 0x4b9   :  { %v5240_v44 = vpack.c.bf16 %v3360_v37, %v3359_v35 }
 0x4ba   :  { %5014 = vmatmul.mubr.msk.f32.vlgmr.msra.gmra.mrb[142].mxu0 %vm3403_vm1, %v3477_v38 }
 0x4bb   :  { %5213 = vmatpush3.bf16.msra.mxu0 %v5212_v47  ;;  %3690 = vmatprep.mubr.f32.mxu0 %v3240_v58  ;;  %v3392_v58 = vld [vmem:[%s7122_s9 + $0x278] sm:$0xff] }
 0x4bc   :  { %5215 = vmatprep.subr.bf16.mxu0 %v5214_v60  ;;  %5253 = vmatpush3.bf16.msra.mxu1 %v5252_v51  ;;  %v5264_v32 = vpack.c.bf16 %v3392_v58, %v3391_v43  ;;  %v3776_v47 = vld [vmem:[%s7123_s10 + $0x58] sm:$0xff]  ;;  %v3777_v60 = vld [vmem:[%s7123_s10 + $0x60] sm:$0xff]  ;;  %v45_v43 = vld [vmem:[%s7117_s4 + $0x10] sm:$0xff] }
 0x4bd   :  { %5254 = vmatprep.subr.bf16.mxu1 %v5508_v17  ;;  %v46_v58 = vld [vmem:[%s7117_s4 + $0x18] sm:$0xff] }
 0x4bf   :  { %5217 = vmatpush3.bf16.msra.mxu0 %v5216_v3 }
 0x4c0   :  { %5219 = vmatprep.subr.bf16.mxu0 %v5218_v0  ;;  %5256 = vmatpush3.bf16.msra.mxu1 %v5255_v54 }
 0x4c1   :  { %5257 = vmatprep.subr.bf16.mxu1 %v5508_v17 }
 0x4c3   :  { %5221 = vmatpush3.bf16.msra.mxu0 %v5220_v24 }
 0x4c4   :  { %5223 = vmatprep.subr.bf16.mxu0 %v5222_v10  ;;  %5259 = vmatpush3.bf16.msra.mxu1 %v5258_v36 }
 0x4c5   :  { %5260 = vmatprep.subr.bf16.mxu1 %v5508_v17 }
 0x4c7   :  { %5225 = vmatpush3.bf16.msra.mxu0 %v5224_v6  ;;  %v3861_v6 = vld [vmem:[%s7123_s10 + $0x90] sm:$0xff] }
 0x4c8   :  { %5227 = vmatprep.subr.bf16.mxu0 %v5226_v16  ;;  %5262 = vmatpush3.bf16.msra.mxu1 %v5261_v22  ;;  %v5276_v16 = vpack.c.bf16 %v3861_v6, %v3860_v8  ;;  %v44_v22 = vld [vmem:[%s7117_s4 + $0x8] sm:$0xff] }
 0x4c9   :  { %5263 = vmatprep.subr.bf16.mxu1 %v5508_v17  ;;  %v5279_v39 = vpack.c.bf16 %v44_v22, %v43_v21 }
 0x4cb   :  { %5229 = vmatpush3.bf16.msra.mxu0 %v5228_v42  ;;  %v5282_v42 = vpack.c.bf16 %v46_v58, %v45_v43 }
 0x4cc   :  { %5231 = vmatprep.subr.bf16.mxu0 %v5230_v33  ;;  %5265 = vmatpush3.bf16.msra.mxu1 %v5264_v32  ;;  %v47_v33 = vld [vmem:[%s7117_s4 + $0x20] sm:$0xff] }
 0x4cf   :  { %5233 = vmatpush3.bf16.msra.mxu0 %v5232_v11  ;;  %5049 = vmatmul.mubr.f32.vlgmr.msra.gmra.mrb[148].mxu1 %v6894_v5  ;;  %v3775_v5 = vld [vmem:[%s7123_s10 + $0x50] sm:$0xff]  ;;  %v4016_v11 = vand.u32 127, %v420_v15 }
 0x4d0   :  { %5235 = vmatprep.subr.bf16.mxu0 %v5234_v61  ;;  %v5267_v38 = vpack.c.bf16 %v3776_v47, %v3775_v5 }
 0x4d1   :  { %vm4017_vm2 = vcmp.eq.s32.totalorder %v4016_v11, 41 }
 0x4d3   :  { %5237 = vmatpush3.bf16.msra.mxu0 %v5236_v41 }
 0x4d4   :  { %5239 = vmatprep.subr.bf16.mxu0 %v5238_v25 }
 0x4d7   :  { %5241 = vmatpush3.bf16.msra.mxu0 %v5240_v44 }
 0x4d8   :  { %5266 = vmatprep.subr.bf16.mxu0 %v5508_v17 }
 0x4da   :  { %3691 = vmatmul.mubr.f32.vlgmr.msra.gmra.mrb[144].mxu0 %v6870_v29  ;;  %v3778_v29 = vld [vmem:[%s7123_s10 + $0x68] sm:$0xff] }
 0x4db   :  { %5061 = vmatprep.mubr.msk.f32.mxu0 %vm5509_vm0, %v5507_v49  ;;  %5268 = vmatpush3.bf16.msra.mxu0 %v5267_v38  ;;  %v5270_v55 = vpack.c.bf16 %v3778_v29, %v3777_v60 }
 0x4dc   :  { %5269 = vmatprep.subr.bf16.mxu0 %v5508_v17 }
 0x4df   :  { %5271 = vmatpush3.bf16.msra.mxu0 %v5270_v55 }
 0x4e0   :  { %5059 = vmatprep.subr.mxu0 %v5507_v49 }
 0x4e3   :  { %5060 = vmatpush3.msra.mxu0 %v3779_v56 }
 0x4e4   :  { %5272 = vmatprep.subr.bf16.mxu0 %v5508_v17 }
 0x581   :  { %v4858_v4 = vpop.f32.mrb[146].mxu1 }
 0x582   :  { %v4859_v51 = vpop.f32.mrb[147].mxu1 }
 0x583   :  { %v4860_v46 = vadd.f32 %v4859_v51, %v4858_v4 }
 0x58d   :  { %v3552_v52 = vpop.f32.mrb[142].mxu0 }
 0x58e   :  { %v3623_v53 = vadd.f32 %v4860_v46, %v3552_v52  ;;  %v5015_v3 = vpop.f32.mrb[143].mxu0 }
 0x5a2   :  { %v3762_v0 = vpop.f32.mrb[148].mxu1 }
 0x5a3   :  { %v5050_v27 = vpop.f32.mrb[149].mxu1 }
 0x5ad   :  { %v4893_v14 = vpop.f32.mrb[144].mxu0 }
 0x5ae   :  { %v4894_v48 = vpop.f32.mrb[145].mxu0 }
 0x5af   :  { %v4895_v54 = vadd.f32 %v4894_v48, %v4893_v14 }
 0x5b1   :  { %v3693_v59 = vadd.f32 %v4895_v54, %v3623_v53 }
 0x5b3   :  { %v3763_v18 = vadd.f32 %v3762_v0, %v3693_v59 }
 0x5b5   :  { %v3770_v24 = vadd.f32 %v3769_v1, %v3763_v18 }
 0x5b7   :  { %v3771_v10 = vand.u32 2147483647, %v3770_v24 }
 0x5b9   :  { %v3772_v23 = vadd.f32 1.0, %v3771_v10 }
 0x5bb   :  { %5477 = vrcp.f32 %v3772_v23 }
 0x5c5   :  { %v5478_v36 = vpop.eup %5477 }
 0x5c6   :  { %v3774_v19 = vmul.f32 %v5478_v36, %v3770_v24 }
 0x5c8   :  { %5062 = vmatmul.mubr.msk.f32.vlgmr.msra.gmra.mrb[146].mxu0 %vm3403_vm1, %v3774_v19 }
 0x5c9   :  { %5274 = vmatpush3.bf16.msra.mxu0 %v5273_v40  ;;  %5074 = vmatprep.mubr.msk.f32.mxu0 %vm5509_vm0, %v5507_v49 }
 0x5ca   :  { %5275 = vmatprep.subr.bf16.mxu0 %v5508_v17 }
 0x5cd   :  { %5277 = vmatpush3.bf16.msra.mxu0 %v5276_v16 }
 0x5ce   :  { %5072 = vmatprep.subr.mxu0 %v5507_v49 }
 0x5d1   :  { %5073 = vmatpush3.msra.mxu0 %v3862_v12 }
 0x5d2   :  { %5075 = vmatmul.mubr.msk.f32.vlgmr.msra.gmra.mrb[146].mxu0 %vm3403_vm1, %v3857_v2  ;;  %5278 = vmatprep.subr.bf16.mxu0 %v5508_v17 }
 0x5d3   :  { %5087 = vmatprep.mubr.msk.f32.mxu0 %vm5509_vm0, %v5507_v49  ;;  %5280 = vmatpush3.bf16.msra.mxu0 %v5279_v39 }
 0x5d4   :  { %5281 = vmatprep.subr.bf16.mxu0 %v5508_v17 }
 0x5d7   :  { %5283 = vmatpush3.bf16.msra.mxu0 %v5282_v42 }
 0x5d8   :  { %5085 = vmatprep.subr.mxu0 %v5507_v49  ;;  %v5481_v49 = vld [vmem:[%s7117_s4 + $0x28] sm:$0x3] }
 0x5d9   :  { %v3941_v17 = vrot.slane %v5481_v49, %v6650_v28 }
 0x5db   :  { %5086 = vmatpush3.msra.mxu0 %v47_v33 }
 0x6a5   :  { %v3932_v50 = vpop.f32.mrb[146].mxu0 }
 0x6a6   :  { %v5300_v32 = vadd.f32 %v3932_v50, %v3783_v34  ;;  %v5076_v30 = vpop.f32.mrb[147].mxu0 }
 0x6a8   :  { %5479 = vtanh.f32 %v5300_v32 }
 0x6b2   :  { %v5480_v62 = vpop.eup %5479 }
 0x6b3   :  { %5088 = vmatmul.mubr.msk.f32.vlgmr.msra.gmra.mrb[148].mxu0 %vm3403_vm1, %v5480_v62 }
 0x786   :  { %v4011_v61 = vpop.f32.mrb[148].mxu0 }
 0x787   :  { %v4012_v45 = vadd.f32 %v4011_v61, %v3941_v17  ;;  %v5089_v20 = vpop.f32.mrb[149].mxu0 }
 0x789   :  { %v4334_v31 = vclamps-f32 %v4012_v45, 1.0 }
 0x78b   :  { %v4020_v57 = vsel %vm4017_vm2, %v4334_v31, %v4012_v45 }
 0x78c   :  { %4021 = vst [vmem:[#allocation2] sm:$0x3] %v4020_v57 }
 0x78d   :  { %5493 = shalt.err (!%p5490_p4)
}
 0x78e   :  { %s5494_s18 = scalar_lea.hbm %s7125_s12, 32 }
 0x78f   :  { %p5495_p5 = scmp.ne.s32.totalorder %s7125_s12, %s5494_s18  ;;  %p5498_p6 = scmp.lt.u32.totalorder %s5494_s18, %s7125_s12 }
 0x791   :  { %p5500_p7 = pnand %p5498_p6, %p5495_p5 }
 0x793   :  { %5503 = shalt.err (!%p5500_p7)
}
 0x794   :  { %4031 = dma.vmem_to_hbm [thread:$0]  %s4029_s15, 32, %s7125_s12, [#allocation3]  }
 0x795   :  { %5504 = dma.done.wait [#allocation3], 32  }
 0x796   :  { %5505 = vsyncadd [#allocation3], 4294967264 }
 0x797   :  { %4035 = vsyncpa [#allocation3], 1 }

</bundles_post_ra>
